<compile_context>
chip_gen: v5e
topology: v5e:2x2
jax: 0.10.0
libtpu: 0.0.40
codegen_flags: <defaults>
</compile_context>

<pallas_src>
import functools

import jax
import jax.numpy as jnp
from jax.experimental import pallas as pl
from jax.experimental.pallas import tpu as pltpu


def _round_up(v, m):
    return (v + m - 1) // m * m


# ---------------------------------------------------------------------------
# Fused kernel: conv1 (im2col matmul) + BN + ReLU -> column-im2col ->
#               conv2 (K=3*C, even/odd streams) + BN + ReLU -> 2x2 max-pool
# ---------------------------------------------------------------------------

def _encoder_fused_kernel(x_ref, w1_ref, b1_ref, w2_ref, b2_ref, o_ref,
                          h1_ref, g_ref, *, H1, Wh, Hp, C):
    """One grid step = one image (grid=(B,)).

    x_ref : (2*Lh, K1)  bf16  conv1 im2col patches; rows ordered
                              (output-column parity, conv1 row, half-column),
                              zero rows for padded half-columns.
    w1_ref: (K1, C)     bf16  conv1 weights (BN folded), lanes padded to C.
    b1_ref: (1, C)      f32   conv1 bias (BN folded).
    w2_ref: (3, 3C, C)  bf16  conv2 row-tap weights (BN folded), contraction
                              blocks ordered (kernel col s, in channel).
    b2_ref: (1, C)      f32   conv2 bias (BN folded).
    o_ref : (Hp, Wh, C) f32   2x2-max-pooled output; columns >= Wp are garbage
                              (cropped by the wrapper).
    h1_ref: (2*Lh+8, C) f32   conv1+ReLU activation: even-column slab, then
                              odd-column slab, then zero guard rows.
    g_ref : (Lh, 4C)    f32   column-im2col slab; lane blocks =
                              (h1_even[q], h1_odd[q], h1_even[q+1], h1_odd[q+1]).
    """
    Lh = H1 * Wh
    M2 = 2 * Hp * Wh            # conv2 rows actually consumed by the pool
    C3 = 3 * C

    # ---- conv1 + BN + ReLU : single bf16 im2col matmul, f32 accumulation ----
    a1 = jnp.dot(x_ref[...], w1_ref[...], preferred_element_type=jnp.float32)
    h1_ref[pl.ds(0, 2 * Lh), :] = jnp.maximum(a1 + b1_ref[...], 0.0)
    h1_ref[pl.ds(2 * Lh, 8), :] = jnp.zeros((8, C), jnp.float32)    # guard rows

    # ---- column-im2col of h1 (4 lane blocks -> conv2 contraction depth 3*C) --
    # The q = Wh-1 / padded half-columns only feed pooled columns >= Wp, which
    # the wrapper crops (invariant asserted in the wrapper).
    g_ref[:, 0 * C:1 * C] = h1_ref[pl.ds(0, Lh), :]          # h1_even[q]
    g_ref[:, 1 * C:2 * C] = h1_ref[pl.ds(Lh, Lh), :]         # h1_odd [q]
    g_ref[:, 2 * C:3 * C] = h1_ref[pl.ds(1, Lh), :]          # h1_even[q+1]
    g_ref[:, 3 * C:4 * C] = h1_ref[pl.ds(Lh + 1, Lh), :]     # h1_odd [q+1]

    # ---- conv2 + BN + ReLU (even / odd output-column streams) + 2x2 pool ----
    def stream(lane0):
        def tap(r):                                          # 3 row taps, K=3*C
            a = g_ref[pl.ds(r * Wh, M2), lane0:lane0 + C3].astype(jnp.bfloat16)
            return jnp.dot(a, w2_ref[r], preferred_element_type=jnp.float32)
        acc = tap(0) + tap(1) + tap(2)                       # (M2, C) f32
        o = jnp.maximum(acc + b2_ref[...], 0.0).reshape(Hp, 2 * Wh, C)
        return jnp.maximum(o[:, :Wh, :], o[:, Wh:, :])       # pool over height

    pooled = jnp.maximum(stream(0), stream(C))               # pool over width
    o_ref[...] = pooled                                      # lane-dense store


# ---------------------------------------------------------------------------
# Wrapper: BN folding, im2col / weight layout plumbing, crop epilogue
# ---------------------------------------------------------------------------

def encoder_block_forward(params, x_nchw, *, eps=1e-5):
    """_EncoderBlock forward (eval mode), NCHW in -> NCHW out."""
    K = 3
    B, Cin0, H, W = x_nchw.shape
    Cout0 = params["conv1"]["w"].shape[0]

    H1, W1 = H - (K - 1), W - (K - 1)            # conv1 output
    H2, W2 = H1 - (K - 1), W1 - (K - 1)          # conv2 output
    Hp, Wp = H2 // 2, W2 // 2                    # pooled output
    assert Hp >= 1 and Wp >= 1, "input too small for two VALID 3x3 convs + pool"

    C = _round_up(max(Cout0, 128), 128)          # lane-dense channel width
    KK = K * K * Cin0
    K1 = _round_up(KK, 16)                       # conv1 im2col contraction depth
    W1E = (W1 + 1) // 2                          # even conv1 columns (>= odd)
    Wh = _round_up(W1E, 8)                       # padded half-width (sublane-aligned)
    Lh = H1 * Wh
    # Crop invariant: padded / wrap half-columns only feed pooled cols >= Wp.
    assert Wp < Wh and Wp + 1 <= W1E

    # ---- fold eval-mode BatchNorm into conv weights/bias (exact) ----
    def fold(cp, bp):
        scale = bp["gamma"] / jnp.sqrt(bp["var"] + eps)
        w = cp["w"] * scale[:, None, None, None]
        b = (cp["b"] - bp["mean"]) * scale + bp["beta"]
        return w, b

    w1, b1 = fold(params["conv1"], params["bn1"])
    w2, b2 = fold(params["conv2"], params["bn2"])

    # ---- conv1 im2col patches, rows ordered (parity, conv1 row, half col) ----
    x = jnp.transpose(x_nchw, (0, 2, 3, 1)).astype(jnp.float32)          # NHWC
    pts = jnp.stack([x[:, di:di + H1, dj:dj + W1, :]
                     for di in range(K) for dj in range(K)], axis=3)
    pts = pts.reshape(B, H1, W1, KK)
    pe = pts[:, :, 0::2, :]                                              # even cols
    po = pts[:, :, 1::2, :]                                              # odd cols
    pe = jnp.pad(pe, ((0, 0), (0, 0), (0, Wh - pe.shape[2]), (0, K1 - KK)))
    po = jnp.pad(po, ((0, 0), (0, 0), (0, Wh - po.shape[2]), (0, K1 - KK)))
    ps = jnp.stack([pe, po], axis=1).reshape(B, 2 * Lh, K1).astype(jnp.bfloat16)

    # ---- weights: conv1 (K1, C); conv2 row-tap stacks (3, 3C, C); bf16 ----
    w1k = jnp.transpose(w1, (2, 3, 1, 0)).reshape(KK, Cout0)
    w1k = jnp.pad(w1k, ((0, K1 - KK), (0, C - Cout0))).astype(jnp.bfloat16)
    b1k = jnp.pad(b1, (0, C - Cout0)).reshape(1, C).astype(jnp.float32)

    w2t = jnp.transpose(w2, (2, 3, 1, 0))                                # (r,s,I,O)
    w2t = jnp.pad(w2t, ((0, 0), (0, 0), (0, C - Cout0), (0, C - Cout0)))
    w2k = w2t.reshape(K, K * C, C).astype(jnp.bfloat16)
    b2k = jnp.pad(b2, (0, C - Cout0)).reshape(1, C).astype(jnp.float32)

    kern = functools.partial(_encoder_fused_kernel, H1=H1, Wh=Wh, Hp=Hp, C=C)
    out = pl.pallas_call(
        kern,
        out_shape=jax.ShapeDtypeStruct((B, Hp, Wh, C), jnp.float32),
        grid_spec=pltpu.PrefetchScalarGridSpec(
            num_scalar_prefetch=0,
            grid=(B,),
            in_specs=[
                pl.BlockSpec((None, 2 * Lh, K1), lambda b: (b, 0, 0)),
                pl.BlockSpec((K1, C), lambda b: (0, 0)),
                pl.BlockSpec((1, C), lambda b: (0, 0)),
                pl.BlockSpec((K, K * C, C), lambda b: (0, 0, 0)),
                pl.BlockSpec((1, C), lambda b: (0, 0)),
            ],
            out_specs=pl.BlockSpec((None, Hp, Wh, C), lambda b: (b, 0, 0, 0)),
            scratch_shapes=[
                pltpu.VMEM((2 * Lh + 8, C), jnp.float32),   # h1 (+ guard rows)
                pltpu.VMEM((Lh, 4 * C), jnp.float32),       # column-im2col slab
            ],
        ),
        compiler_params=pltpu.CompilerParams(
            dimension_semantics=("parallel",)),   # batch across TCs (v7x megacore)
    )(ps, w1k, b1k, w2k, b2k)

    # Crop padded half-columns + padded channels, back to NCHW.
    # TODO(synk): 75% of the 128 output lanes are channel padding (Cout=32);
    #             pack 4 pooled pixels x 32 ch per 128 lanes if it ever matters.
    y = out[:, :, :Wp, :Cout0]
    return jnp.transpose(y, (0, 3, 1, 2))


# ---------------------------------------------------------------------------
# Deterministic parameter init (eval-mode BN with synthetic running stats)
# ---------------------------------------------------------------------------

def init_encoder_block(seed, in_channels, out_channels):
    ks = jax.random.split(jax.random.PRNGKey(seed), 4)

    def conv(k, cout, cin, ksz):
        kw, kb = jax.random.split(k)
        bound = 1.0 / float((cin * ksz * ksz) ** 0.5)
        return {"w": jax.random.uniform(kw, (cout, cin, ksz, ksz), jnp.float32,
                                        -bound, bound),
                "b": jax.random.uniform(kb, (cout,), jnp.float32, -bound, bound)}

    def bn(k, c):
        k1, k2, k3, k4 = jax.random.split(k, 4)
        return {"gamma": 1.0 + 0.1 * jax.random.normal(k1, (c,), jnp.float32),
                "beta": 0.05 * jax.random.normal(k2, (c,), jnp.float32),
                "mean": 0.05 * jax.random.normal(k3, (c,), jnp.float32),
                "var": 0.8 + 0.4 * jax.random.uniform(k4, (c,), jnp.float32)}

    return {"conv1": conv(ks[0], out_channels, in_channels, 3),
            "bn1": bn(ks[1], out_channels),
            "conv2": conv(ks[2], out_channels, out_channels, 3),
            "bn2": bn(ks[3], out_channels)}


# ---------------------------------------------------------------------------
# Pure-JAX reference (for numerical validation)
# ---------------------------------------------------------------------------

def _reference_forward(params, x, eps=1e-5):
    def conv_bn_relu(z, cp, bp):
        y = jax.lax.conv_general_dilated(
            z, cp["w"], window_strides=(1, 1), padding="VALID",
            dimension_numbers=("NCHW", "OIHW", "NCHW"))
        y = y + cp["b"][None, :, None, None]
        scale = (bp["gamma"] / jnp.sqrt(bp["var"] + eps))[None, :, None, None]
        y = (y - bp["mean"][None, :, None, None]) * scale + bp["beta"][None, :, None, None]
        return jnp.maximum(y, 0.0)

    y = conv_bn_relu(x, params["conv1"], params["bn1"])
    y = conv_bn_relu(y, params["conv2"], params["bn2"])
    return jax.lax.reduce_window(y, -jnp.inf, jax.lax.max,
                                 (1, 1, 2, 2), (1, 1, 2, 2), "VALID")


# ---------------------------------------------------------------------------

if __name__ == "__main__":
    B, Cin, Cout, H, W = 2, 4, 32, 16, 16
    x = jax.random.uniform(jax.random.PRNGKey(0), (B, Cin, H, W), jnp.float32)
    params = init_encoder_block(0, Cin, Cout)

    fwd = jax.jit(encoder_block_forward)
    out = fwd(params, x)
    jax.block_until_ready(out)

    assert out.shape == (B, Cout, (H - 4) // 2, (W - 4) // 2), out.shape
    assert bool(jnp.all(jnp.isfinite(out)))

    ref = _reference_forward(params, x)
    err = float(jnp.max(jnp.abs(out - ref)))
    # bf16 MXU operands with f32 accumulation -> tolerance loosened vs pure f32.
    assert bool(jnp.allclose(out, ref, atol=5e-2, rtol=5e-2)), err

    print("KERNEL_OK")
</pallas_src>

<mosaic_0001>
module attributes {stable_mosaic.version = 11 : i64} {
  func.func @_encoder_fused_kernel(%arg0: i32, %arg1: memref<1x224x48xbf16, #tpu.memory_space<vmem>>, %arg2: memref<48x128xbf16, #tpu.memory_space<vmem>>, %arg3: memref<1x128xf32, #tpu.memory_space<vmem>>, %arg4: memref<3x384x128xbf16, #tpu.memory_space<vmem>>, %arg5: memref<1x128xf32, #tpu.memory_space<vmem>>, %arg6: memref<1x6x8x128xf32, #tpu.memory_space<vmem>>, %arg7: memref<232x128xf32, #tpu.memory_space<vmem>>, %arg8: memref<112x512xf32, #tpu.memory_space<vmem>>) attributes {dimension_semantics = [#tpu.dimension_semantics<parallel>], iteration_bounds = array<i64: 2>, scalar_prefetch = 0 : i64, scratch_operands = 2 : i64, tpu.core_type = #tpu.core_type<tc>, window_params = [{transform_indices = @transform_0, window_bounds = array<i64: 1, 224, 48>}, {pipeline_mode = #tpu.pipeline_mode<synchronous>, transform_indices = @transform_1, window_bounds = array<i64: 48, 128>}, {pipeline_mode = #tpu.pipeline_mode<synchronous>, transform_indices = @transform_2, window_bounds = array<i64: 1, 128>}, {pipeline_mode = #tpu.pipeline_mode<synchronous>, transform_indices = @transform_3, window_bounds = array<i64: 3, 384, 128>}, {pipeline_mode = #tpu.pipeline_mode<synchronous>, transform_indices = @transform_4, window_bounds = array<i64: 1, 128>}, {transform_indices = @transform_5, window_bounds = array<i64: 1, 6, 8, 128>}]} {
    %c0 = arith.constant 0 : index
    %c0_0 = arith.constant 0 : index
    %c0_1 = arith.constant 0 : index
    %0 = vector.load %arg1[%c0, %c0_0, %c0_1] : memref<1x224x48xbf16, #tpu.memory_space<vmem>>, vector<1x224x48xbf16>
    %1 = vector.shape_cast %0 : vector<1x224x48xbf16> to vector<224x48xbf16>
    %c0_2 = arith.constant 0 : index
    %c0_3 = arith.constant 0 : index
    %2 = vector.load %arg2[%c0_2, %c0_3] : memref<48x128xbf16, #tpu.memory_space<vmem>>, vector<48x128xbf16>
    %cst = arith.constant dense<0.000000e+00> : vector<224x128xf32>
    %3 = tpu.matmul %1, %2, %cst {dimension_numbers = #tpu.dot_dimension_numbers<[1], [0], [0], [1], [0, 0, 1, 1], [], []>} : vector<224x48xbf16>, vector<48x128xbf16>, vector<224x128xf32> -> vector<224x128xf32>
    %c0_4 = arith.constant 0 : index
    %c0_5 = arith.constant 0 : index
    %4 = vector.load %arg3[%c0_4, %c0_5] : memref<1x128xf32, #tpu.memory_space<vmem>>, vector<1x128xf32>
    %5 = vector.broadcast %4 : vector<1x128xf32> to vector<224x128xf32>
    %6 = arith.addf %3, %5 : vector<224x128xf32>
    %cst_6 = arith.constant 0.000000e+00 : f32
    %7 = vector.broadcast %cst_6 : f32 to vector<224x128xf32>
    %8 = arith.maximumf %6, %7 : vector<224x128xf32>
    %c0_7 = arith.constant 0 : index
    %c0_8 = arith.constant 0 : index
    %9 = vector.load %arg7[%c0_7, %c0_8] : memref<232x128xf32, #tpu.memory_space<vmem>>, vector<224x128xf32>
    tpu.vector_store %arg7[%c0_7, %c0_8], %8 {strides = array<i32>} : memref<232x128xf32, #tpu.memory_space<vmem>>, vector<224x128xf32>,
    %cst_9 = arith.constant 0.000000e+00 : f32
    %10 = vector.broadcast %cst_9 : f32 to vector<8x128xf32>
    %c224 = arith.constant 224 : index
    %c0_10 = arith.constant 0 : index
    %11 = vector.load %arg7[%c224, %c0_10] : memref<232x128xf32, #tpu.memory_space<vmem>>, vector<8x128xf32>
    tpu.vector_store %arg7[%c224, %c0_10], %10 {strides = array<i32>} : memref<232x128xf32, #tpu.memory_space<vmem>>, vector<8x128xf32>,
    %c0_11 = arith.constant 0 : index
    %c0_12 = arith.constant 0 : index
    %12 = vector.load %arg7[%c0_11, %c0_12] : memref<232x128xf32, #tpu.memory_space<vmem>>, vector<112x128xf32>
    %c0_13 = arith.constant 0 : index
    %c0_14 = arith.constant 0 : index
    %13 = vector.load %arg8[%c0_13, %c0_14] : memref<112x512xf32, #tpu.memory_space<vmem>>, vector<112x128xf32>
    tpu.vector_store %arg8[%c0_13, %c0_14], %12 {strides = array<i32>} : memref<112x512xf32, #tpu.memory_space<vmem>>, vector<112x128xf32>,
    %c112 = arith.constant 112 : index
    %c0_15 = arith.constant 0 : index
    %14 = vector.load %arg7[%c112, %c0_15] : memref<232x128xf32, #tpu.memory_space<vmem>>, vector<112x128xf32>
    %c0_16 = arith.constant 0 : index
    %c128 = arith.constant 128 : index
    %15 = vector.load %arg8[%c0_16, %c128] : memref<112x512xf32, #tpu.memory_space<vmem>>, vector<112x128xf32>
    tpu.vector_store %arg8[%c0_16, %c128], %14 {strides = array<i32>} : memref<112x512xf32, #tpu.memory_space<vmem>>, vector<112x128xf32>,
    %c1 = arith.constant 1 : index
    %c0_17 = arith.constant 0 : index
    %16 = vector.load %arg7[%c1, %c0_17] : memref<232x128xf32, #tpu.memory_space<vmem>>, vector<112x128xf32>
    %c0_18 = arith.constant 0 : index
    %c256 = arith.constant 256 : index
    %17 = vector.load %arg8[%c0_18, %c256] : memref<112x512xf32, #tpu.memory_space<vmem>>, vector<112x128xf32>
    tpu.vector_store %arg8[%c0_18, %c256], %16 {strides = array<i32>} : memref<112x512xf32, #tpu.memory_space<vmem>>, vector<112x128xf32>,
    %c113 = arith.constant 113 : index
    %c0_19 = arith.constant 0 : index
    %18 = vector.load %arg7[%c113, %c0_19] : memref<232x128xf32, #tpu.memory_space<vmem>>, vector<112x128xf32>
    %c0_20 = arith.constant 0 : index
    %c384 = arith.constant 384 : index
    %19 = vector.load %arg8[%c0_20, %c384] : memref<112x512xf32, #tpu.memory_space<vmem>>, vector<112x128xf32>
    tpu.vector_store %arg8[%c0_20, %c384], %18 {strides = array<i32>} : memref<112x512xf32, #tpu.memory_space<vmem>>, vector<112x128xf32>,
    %c0_21 = arith.constant 0 : index
    %c0_22 = arith.constant 0 : index
    %20 = vector.load %arg8[%c0_21, %c0_22] : memref<112x512xf32, #tpu.memory_space<vmem>>, vector<96x384xf32>
    %21 = arith.truncf %20 : vector<96x384xf32> to vector<96x384xbf16>
    %c0_23 = arith.constant 0 : index
    %c0_24 = arith.constant 0 : index
    %c0_25 = arith.constant 0 : index
    %22 = vector.load %arg4[%c0_23, %c0_24, %c0_25] : memref<3x384x128xbf16, #tpu.memory_space<vmem>>, vector<1x384x128xbf16>
    %23 = vector.shape_cast %22 : vector<1x384x128xbf16> to vector<384x128xbf16>
    %cst_26 = arith.constant dense<0.000000e+00> : vector<96x128xf32>
    %24 = tpu.matmul %21, %23, %cst_26 {dimension_numbers = #tpu.dot_dimension_numbers<[1], [0], [0], [1], [0, 0, 1, 1], [], []>} : vector<96x384xbf16>, vector<384x128xbf16>, vector<96x128xf32> -> vector<96x128xf32>
    %c8 = arith.constant 8 : index
    %c0_27 = arith.constant 0 : index
    %25 = vector.load %arg8[%c8, %c0_27] : memref<112x512xf32, #tpu.memory_space<vmem>>, vector<96x384xf32>
    %26 = arith.truncf %25 : vector<96x384xf32> to vector<96x384xbf16>
    %c1_28 = arith.constant 1 : index
    %c0_29 = arith.constant 0 : index
    %c0_30 = arith.constant 0 : index
    %27 = vector.load %arg4[%c1_28, %c0_29, %c0_30] : memref<3x384x128xbf16, #tpu.memory_space<vmem>>, vector<1x384x128xbf16>
    %28 = vector.shape_cast %27 : vector<1x384x128xbf16> to vector<384x128xbf16>
    %cst_31 = arith.constant dense<0.000000e+00> : vector<96x128xf32>
    %29 = tpu.matmul %26, %28, %cst_31 {dimension_numbers = #tpu.dot_dimension_numbers<[1], [0], [0], [1], [0, 0, 1, 1], [], []>} : vector<96x384xbf16>, vector<384x128xbf16>, vector<96x128xf32> -> vector<96x128xf32>
    %30 = arith.addf %24, %29 : vector<96x128xf32>
    %c16 = arith.constant 16 : index
    %c0_32 = arith.constant 0 : index
    %31 = vector.load %arg8[%c16, %c0_32] : memref<112x512xf32, #tpu.memory_space<vmem>>, vector<96x384xf32>
    %32 = arith.truncf %31 : vector<96x384xf32> to vector<96x384xbf16>
    %c2 = arith.constant 2 : index
    %c0_33 = arith.constant 0 : index
    %c0_34 = arith.constant 0 : index
    %33 = vector.load %arg4[%c2, %c0_33, %c0_34] : memref<3x384x128xbf16, #tpu.memory_space<vmem>>, vector<1x384x128xbf16>
    %34 = vector.shape_cast %33 : vector<1x384x128xbf16> to vector<384x128xbf16>
    %cst_35 = arith.constant dense<0.000000e+00> : vector<96x128xf32>
    %35 = tpu.matmul %32, %34, %cst_35 {dimension_numbers = #tpu.dot_dimension_numbers<[1], [0], [0], [1], [0, 0, 1, 1], [], []>} : vector<96x384xbf16>, vector<384x128xbf16>, vector<96x128xf32> -> vector<96x128xf32>
    %36 = arith.addf %30, %35 : vector<96x128xf32>
    %c0_36 = arith.constant 0 : index
    %c0_37 = arith.constant 0 : index
    %37 = vector.load %arg5[%c0_36, %c0_37] : memref<1x128xf32, #tpu.memory_space<vmem>>, vector<1x128xf32>
    %38 = vector.broadcast %37 : vector<1x128xf32> to vector<96x128xf32>
    %39 = arith.addf %36, %38 : vector<96x128xf32>
    %cst_38 = arith.constant 0.000000e+00 : f32
    %40 = vector.broadcast %cst_38 : f32 to vector<96x128xf32>
    %41 = arith.maximumf %39, %40 : vector<96x128xf32>
    %42 = vector.shape_cast %41 : vector<96x128xf32> to vector<6x16x128xf32>
    %43 = vector.extract_strided_slice %42 {offsets = [0, 0, 0], sizes = [6, 8, 128], strides = [1, 1, 1]} : vector<6x16x128xf32> to vector<6x8x128xf32>
    %44 = vector.extract_strided_slice %42 {offsets = [0, 8, 0], sizes = [6, 8, 128], strides = [1, 1, 1]} : vector<6x16x128xf32> to vector<6x8x128xf32>
    %45 = arith.maximumf %43, %44 : vector<6x8x128xf32>
    %c0_39 = arith.constant 0 : index
    %c128_40 = arith.constant 128 : index
    %46 = vector.load %arg8[%c0_39, %c128_40] : memref<112x512xf32, #tpu.memory_space<vmem>>, vector<96x384xf32>
    %47 = arith.truncf %46 : vector<96x384xf32> to vector<96x384xbf16>
    %c0_41 = arith.constant 0 : index
    %c0_42 = arith.constant 0 : index
    %c0_43 = arith.constant 0 : index
    %48 = vector.load %arg4[%c0_41, %c0_42, %c0_43] : memref<3x384x128xbf16, #tpu.memory_space<vmem>>, vector<1x384x128xbf16>
    %49 = vector.shape_cast %48 : vector<1x384x128xbf16> to vector<384x128xbf16>
    %cst_44 = arith.constant dense<0.000000e+00> : vector<96x128xf32>
    %50 = tpu.matmul %47, %49, %cst_44 {dimension_numbers = #tpu.dot_dimension_numbers<[1], [0], [0], [1], [0, 0, 1, 1], [], []>} : vector<96x384xbf16>, vector<384x128xbf16>, vector<96x128xf32> -> vector<96x128xf32>
    %c8_45 = arith.constant 8 : index
    %c128_46 = arith.constant 128 : index
    %51 = vector.load %arg8[%c8_45, %c128_46] : memref<112x512xf32, #tpu.memory_space<vmem>>, vector<96x384xf32>
    %52 = arith.truncf %51 : vector<96x384xf32> to vector<96x384xbf16>
    %c1_47 = arith.constant 1 : index
    %c0_48 = arith.constant 0 : index
    %c0_49 = arith.constant 0 : index
    %53 = vector.load %arg4[%c1_47, %c0_48, %c0_49] : memref<3x384x128xbf16, #tpu.memory_space<vmem>>, vector<1x384x128xbf16>
    %54 = vector.shape_cast %53 : vector<1x384x128xbf16> to vector<384x128xbf16>
    %cst_50 = arith.constant dense<0.000000e+00> : vector<96x128xf32>
    %55 = tpu.matmul %52, %54, %cst_50 {dimension_numbers = #tpu.dot_dimension_numbers<[1], [0], [0], [1], [0, 0, 1, 1], [], []>} : vector<96x384xbf16>, vector<384x128xbf16>, vector<96x128xf32> -> vector<96x128xf32>
    %56 = arith.addf %50, %55 : vector<96x128xf32>
    %c16_51 = arith.constant 16 : index
    %c128_52 = arith.constant 128 : index
    %57 = vector.load %arg8[%c16_51, %c128_52] : memref<112x512xf32, #tpu.memory_space<vmem>>, vector<96x384xf32>
    %58 = arith.truncf %57 : vector<96x384xf32> to vector<96x384xbf16>
    %c2_53 = arith.constant 2 : index
    %c0_54 = arith.constant 0 : index
    %c0_55 = arith.constant 0 : index
    %59 = vector.load %arg4[%c2_53, %c0_54, %c0_55] : memref<3x384x128xbf16, #tpu.memory_space<vmem>>, vector<1x384x128xbf16>
    %60 = vector.shape_cast %59 : vector<1x384x128xbf16> to vector<384x128xbf16>
    %cst_56 = arith.constant dense<0.000000e+00> : vector<96x128xf32>
    %61 = tpu.matmul %58, %60, %cst_56 {dimension_numbers = #tpu.dot_dimension_numbers<[1], [0], [0], [1], [0, 0, 1, 1], [], []>} : vector<96x384xbf16>, vector<384x128xbf16>, vector<96x128xf32> -> vector<96x128xf32>
    %62 = arith.addf %56, %61 : vector<96x128xf32>
    %c0_57 = arith.constant 0 : index
    %c0_58 = arith.constant 0 : index
    %63 = vector.load %arg5[%c0_57, %c0_58] : memref<1x128xf32, #tpu.memory_space<vmem>>, vector<1x128xf32>
    %64 = vector.broadcast %63 : vector<1x128xf32> to vector<96x128xf32>
    %65 = arith.addf %62, %64 : vector<96x128xf32>
    %cst_59 = arith.constant 0.000000e+00 : f32
    %66 = vector.broadcast %cst_59 : f32 to vector<96x128xf32>
    %67 = arith.maximumf %65, %66 : vector<96x128xf32>
    %68 = vector.shape_cast %67 : vector<96x128xf32> to vector<6x16x128xf32>
    %69 = vector.extract_strided_slice %68 {offsets = [0, 0, 0], sizes = [6, 8, 128], strides = [1, 1, 1]} : vector<6x16x128xf32> to vector<6x8x128xf32>
    %70 = vector.extract_strided_slice %68 {offsets = [0, 8, 0], sizes = [6, 8, 128], strides = [1, 1, 1]} : vector<6x16x128xf32> to vector<6x8x128xf32>
    %71 = arith.maximumf %69, %70 : vector<6x8x128xf32>
    %72 = arith.maximumf %45, %71 : vector<6x8x128xf32>
    %c0_60 = arith.constant 0 : index
    %c0_61 = arith.constant 0 : index
    %c0_62 = arith.constant 0 : index
    %c0_63 = arith.constant 0 : index
    %73 = vector.load %arg6[%c0_60, %c0_61, %c0_62, %c0_63] : memref<1x6x8x128xf32, #tpu.memory_space<vmem>>, vector<1x6x8x128xf32>
    %74 = vector.shape_cast %73 : vector<1x6x8x128xf32> to vector<6x8x128xf32>
    %75 = vector.shape_cast %72 : vector<6x8x128xf32> to vector<1x6x8x128xf32>
    tpu.vector_store %arg6[%c0_60, %c0_61, %c0_62, %c0_63], %75 {strides = array<i32>} : memref<1x6x8x128xf32, #tpu.memory_space<vmem>>, vector<1x6x8x128xf32>,
    return
  }
  func.func @transform_0(%arg0: i32) -> (i32, i32, i32) {
    %c0_i32 = arith.constant 0 : i32
    %c0_i32_0 = arith.constant 0 : i32
    %c0_i32_1 = arith.constant 0 : i32
    return %arg0, %c0_i32, %c0_i32_0 : i32, i32, i32
  }
  func.func @transform_1(%arg0: i32) -> (i32, i32) {
    %c0_i32 = arith.constant 0 : i32
    %c0_i32_0 = arith.constant 0 : i32
    %c0_i32_1 = arith.constant 0 : i32
    return %c0_i32, %c0_i32_0 : i32, i32
  }
  func.func @transform_2(%arg0: i32) -> (i32, i32) {
    %c0_i32 = arith.constant 0 : i32
    %c0_i32_0 = arith.constant 0 : i32
    %c0_i32_1 = arith.constant 0 : i32
    return %c0_i32, %c0_i32_0 : i32, i32
  }
  func.func @transform_3(%arg0: i32) -> (i32, i32, i32) {
    %c0_i32 = arith.constant 0 : i32
    %c0_i32_0 = arith.constant 0 : i32
    %c0_i32_1 = arith.constant 0 : i32
    %c0_i32_2 = arith.constant 0 : i32
    return %c0_i32, %c0_i32_0, %c0_i32_1 : i32, i32, i32
  }
  func.func @transform_4(%arg0: i32) -> (i32, i32) {
    %c0_i32 = arith.constant 0 : i32
    %c0_i32_0 = arith.constant 0 : i32
    %c0_i32_1 = arith.constant 0 : i32
    return %c0_i32, %c0_i32_0 : i32, i32
  }
  func.func @transform_5(%arg0: i32) -> (i32, i32, i32, i32) {
    %c0_i32 = arith.constant 0 : i32
    %c0_i32_0 = arith.constant 0 : i32
    %c0_i32_1 = arith.constant 0 : i32
    %c0_i32_2 = arith.constant 0 : i32
    return %arg0, %c0_i32, %c0_i32_0, %c0_i32_1 : i32, i32, i32, i32
  }
}

</mosaic_0001>

<bundles_post_ra>
// kernel: encoder_block_forward.1
= control target key start
LH: loop header
LB: loop body
LE: loop exit
PB: predicated region body
PF: predicated region fallthrough
CT: control target
= control target key end

     0   :  { %s2952_s18 = smov 0   ;;  %s4105_s0 = inlined_call_operand.vmem [shape: bf16[2,224,48], index: 0, kind: input, shape index: {}]   ;;  %s4106_s1 = inlined_call_operand.vmem [shape: bf16[48,128], index: 1, kind: input, shape index: {}]   ;;  %s4107_s2 = inlined_call_operand.vmem [shape: f32[1,128], index: 2, kind: input, shape index: {}]   ;;  %s4108_s3 = inlined_call_operand.vmem [shape: bf16[3,384,128], index: 3, kind: input, shape index: {}]   ;;  %s4109_s4 = inlined_call_operand.vmem [shape: f32[1,128], index: 4, kind: input, shape index: {}]   ;;  %s4110_s5 = inlined_call_operand.vmem [shape: f32[2,6,8,128], index: 5, kind: output, shape index: {}]  }
   0x1 LB: > { %s2336_s19 = sadd.s32 4294967295, %s2919_s18   ;;  %p2340_p0 = scmp.ge.s32.totalorder %s2919_s18, 1  ;;  %s2919_s18 = sphi %s2952_s18, %s15_s18  }
   0x2   : > { %p187_p1 = scmp.lt.s32.totalorder %s2919_s18, 3 }
   0x4   : > { %p188_p2 = pnand %p2340_p0, %p187_p1 }
   0x6   : > { %191 = sbr.rel (%p188_p2) target bundleno = 902 (0x386), region = 40 }
   0xb   : > { %v2827_v0 = vld [vmem:[%s4106_s1 + $0x10] sm:$0xff]  ;;  %p215_p3 = scmp.lt.s32.totalorder %s2336_s19, 1  ;;  %v2826_v1 = vld [vmem:[%s4106_s1 + $0x8] sm:$0xff]  ;;  %v2825_v2 = vld [vmem:[%s4106_s1] sm:$0xff]  ;;  %vm352_vm0 = vcmask 392192  }
   0xc   : > { %400 = vmatpush.bf16.msra.mxu0 %v2827_v0  ;;  %v2859_v9 = vld [vmem:[%s4108_s3 + $0xf8] sm:$0xff]  ;;  %v2858_v10 = vld [vmem:[%s4108_s3 + $0xf0] sm:$0xff]  ;;  %v2857_v11 = vld [vmem:[%s4108_s3 + $0xe8] sm:$0xff] }
   0xd   : > { %s4252_s19 = smov (!%p215_p3, %s2336_s19), 1  ;;  %959 = vmatpush.bf16.msra.mxu1 %v2859_v9  ;;  %v2856_v13 = vld [vmem:[%s4108_s3 + $0xe0] sm:$0xff]  ;;  %v3006_v14 = vld [vmem:[%s4108_s3 + $0x178] sm:$0xff]  ;;  %v3015_v16 = vld [vmem:[%s4108_s3 + $0x170] sm:$0xff] }
   0xe   : > { %s2900_s24 = smul.u32 112, %s4252_s19  ;;  %v2855_v15 = vld [vmem:[%s4108_s3 + $0xd8] sm:$0xff]  ;;  %1037 = vmatpush.bf16.msra.mxu3 %v3006_v14  ;;  %4146 = vst [vmem:[#allocation4_spill] sm:$0xff] %v3015_v16  ;;  %v2854_v17 = vld [vmem:[%s4108_s3 + $0xd0] sm:$0xff]  ;;  %v3024_v18 = vld [vmem:[%s4108_s3 + $0x168] sm:$0xff] }
   0xf   : > { %4147 = vst [vmem:[#allocation5_spill] sm:$0xff] %v3024_v18  ;;  %v2853_v19 = vld [vmem:[%s4108_s3 + $0xc8] sm:$0xff]  ;;  %v3034_v21 = vld [vmem:[%s4108_s3 + $0x160] sm:$0xff]  ;;  %v3044_v23 = vld [vmem:[%s4108_s3 + $0x158] sm:$0xff]  ;;  %s2901_s17 = smul.u32 48, %s4252_s19 }
  0x10   : > { %401 = vmatpush.bf16.msra.mxu0 %v2826_v1  ;;  %s2975_s29 = scalar_lea.vmem %s4105_s0, %s2900_s24  ;;  %4148 = vst [vmem:[#allocation6_spill] sm:$0xff] %v3034_v21  ;;  %v2852_v22 = vld [vmem:[%s4108_s3 + $0xc0] sm:$0xff]  ;;  %v3050_v24 = vld [vmem:[%s4108_s3 + $0x150] sm:$0xff]  ;;  %v3061_v26 = vld [vmem:[%s4108_s3 + $0x148] sm:$0xff] }
  0x11   : > { %v2811_v3 = vld [vmem:[%s2975_s29] sm:$0xff]  ;;  %v2812_v4 = vld [vmem:[%s2975_s29 + $0x8] sm:$0xff]  ;;  %v2813_v5 = vld [vmem:[%s2975_s29 + $0x10] sm:$0xff]  ;;  %960 = vmatpush.bf16.msra.mxu1 %v2858_v10  ;;  %4149 = vst [vmem:[#allocation7_spill] sm:$0xff] %v3044_v23  ;;  %s4053_s22 = scalar_lea.vmem %s4110_s5, %s2901_s17 }
  0x12   : > { %v2814_v6 = vld [vmem:[%s2975_s29 + $0x18] sm:$0xff]  ;;  %v2815_v7 = vld [vmem:[%s2975_s29 + $0x20] sm:$0xff]  ;;  %v2816_v8 = vld [vmem:[%s2975_s29 + $0x28] sm:$0xff]  ;;  %1038 = vmatpush.bf16.msra.mxu3 %v3015_v16  ;;  %4150 = vst [vmem:[#allocation8_spill] sm:$0xff] %v3050_v24 }
  0x13   : > { %v2817_v12 = vld [vmem:[%s2975_s29 + $0x30] sm:$0xff]  ;;  %v2818_v20 = vld [vmem:[%s2975_s29 + $0x38] sm:$0xff]  ;;  %v3056_v25 = vld [vmem:[%s4107_s2] ss:$0 sm:$0xff]  ;;  %4151 = vst [vmem:[#allocation9_spill] sm:$0xff] %v3061_v26 }
  0x14   : > { %402 = vmatpush.bf16.msra.mxu0 %v2825_v2  ;;  %v2819_v27 = vld [vmem:[%s2975_s29 + $0x40] sm:$0xff]  ;;  %v2820_v36 = vld [vmem:[%s2975_s29 + $0x48] sm:$0xff]  ;;  %v2821_v45 = vld [vmem:[%s2975_s29 + $0x50] sm:$0xff] }
  0x15   : > { %961 = vmatpush.bf16.msra.mxu1 %v2857_v11  ;;  %v3069_v30 = vld [vmem:[%s4108_s3 + $0x140] sm:$0xff]  ;;  %v2822_v59 = vld [vmem:[%s2975_s29 + $0x58] sm:$0xff] }
  0x16   : > { %1039 = vmatpush.bf16.msra.mxu3 %v3024_v18  ;;  %4152 = vst [vmem:[#allocation10_spill] sm:$0xff] %v3069_v30  ;;  %v3104_v2 = vld [vmem:[%s4108_s3 + $0x38] sm:$0xff] }
  0x17   : > { %2411 = vmatmul.msk.bf16.vlgmr.msra.gmra.mxu0 %vm352_vm0, %v2811_v3 }
  0x18   : > { %1822 = vmatpush.bf16.msrb.mxu0 %v2859_v9 }
  0x19   : > { %962 = vmatpush.bf16.msra.mxu1 %v2856_v13 }
  0x1a   : > { %1040 = vmatpush.bf16.msra.mxu3 %v3034_v21 }
  0x1c   : > { %1823 = vmatpush.bf16.msrb.mxu0 %v2858_v10  ;;  %v3122_v10 = vld [vmem:[%s4108_s3 + $0x28] sm:$0xff] }
  0x1d   : > { %963 = vmatpush.bf16.msra.mxu1 %v2855_v15 }
  0x1e   : > { %1041 = vmatpush.bf16.msra.mxu3 %v3044_v23 }
  0x20   : > { %1824 = vmatpush.bf16.msrb.mxu0 %v2857_v11  ;;  %v2823_v11 = vld [vmem:[%s2975_s29 + $0x60] sm:$0xff] }
  0x21   : > { %964 = vmatpush.bf16.msra.mxu1 %v2854_v17 }
  0x22   : > { %1042 = vmatpush.bf16.msra.mxu3 %v3050_v24  ;;  %v3414_v24 = vld [vmem:[%s4108_s3 + $0x220] sm:$0xff] }
  0x24   : > { %1825 = vmatpush.bf16.msrb.mxu0 %v2856_v13 }
  0x25   : > { %965 = vmatpush.bf16.msra.mxu1 %v2853_v19 }
  0x26   : > { %1043 = vmatpush.bf16.msra.mxu3 %v3061_v26 }
  0x27   : > { %2412 = vmatmul.msk.bf16.gmra.mxu0 %vm352_vm0, %v2812_v4 }
  0x28   : > { %1826 = vmatpush.bf16.msrb.mxu0 %v2855_v15  ;;  %v3130_v15 = vld [vmem:[%s4108_s3 + $0x20] sm:$0xff] }
  0x29   : > { %966 = vmatpush.bf16.msra.mxu1 %v2852_v22 }
  0x2a   : > { %1044 = vmatpush.bf16.msra.mxu3 %v3069_v30 }
  0x2c   : > { %1827 = vmatpush.bf16.msrb.mxu0 %v2854_v17 }
  0x2d   : > { %1220 = vmatpush.bf16.msrb.mxu1 %v3104_v2 }
  0x30   : > { %1828 = vmatpush.bf16.msrb.mxu0 %v2853_v19 }
  0x34   : > { %1829 = vmatpush.bf16.msrb.mxu0 %v2852_v22 }
  0x37   : > { %2413 = vmatmul.msk.bf16.gmra.mxu0 %vm352_vm0, %v2813_v5  ;;  %v3112_v5 = vld [vmem:[%s4108_s3 + $0x30] sm:$0xff] }
  0x38   : > { %1221 = vmatpush.bf16.msrb.mxu1 %v3112_v5 }
  0x3c   : > { %1222 = vmatpush.bf16.msrb.mxu1 %v3122_v10 }
  0x40   : > { %1223 = vmatpush.bf16.msrb.mxu1 %v3130_v15 }
  0x47   : > { %2414 = vmatmul.msk.bf16.gmra.mxu0 %vm352_vm0, %v2814_v6 }
  0x57   : > { %2415 = vmatmul.msk.bf16.gmra.mxu0 %vm352_vm0, %v2815_v7 }
  0x67   : > { %2416 = vmatmul.msk.bf16.gmra.mxu0 %vm352_vm0, %v2816_v8 }
  0x77   : > { %2417 = vmatmul.msk.bf16.gmra.mxu0 %vm352_vm0, %v2817_v12 }
  0x87   : > { %2418 = vmatmul.msk.bf16.gmra.mxu0 %vm352_vm0, %v2818_v20 }
  0x94   : > { %v404_v28 = vpop.f32.mrf.mxu0 }
  0x95   : > { %v405_v29 = vadd.f32 %v3056_v25, %v404_v28  ;;  %v3144_v28 = vld [vmem:[%s4108_s3 + $0x138] sm:$0xff] }
  0x96   : > { %998 = vmatpush.bf16.msra.mxu2 %v3144_v28 }
  0x97   : > { %v474_v31 = vmax.f32 %v405_v29, 0.0  ;;  %2419 = vmatmul.msk.bf16.gmra.mxu0 %vm352_vm0, %v2819_v27  ;;  %v3139_v27 = vld [vmem:[%s4108_s3 + $0xb8] sm:$0xff] }
  0x98   : > { %v3149_v29 = vld [vmem:[%s4108_s3 + $0x18] sm:$0xff]  ;;  %1298 = vmatpush.bf16.msrb.mxu3 %v3139_v27 }
  0x99   : > { %502 = vst [vmem:[#allocation2] sm:$0xff] %v474_v31  ;;  %1224 = vmatpush.bf16.msrb.mxu1 %v3149_v29 }
  0x9c   : > { %v406_v32 = vpop.f32.mrf.mxu0 }
  0x9d   : > { %v407_v33 = vadd.f32 %v3056_v25, %v406_v32 }
  0x9f   : > { %v475_v34 = vmax.f32 %v407_v33, 0.0  ;;  %v3159_v33 = vld [vmem:[%s4108_s3 + $0xb0] sm:$0xff] }
  0xa0   : > { %1299 = vmatpush.bf16.msrb.mxu3 %v3159_v33 }
  0xa1   : > { %503 = vst [vmem:[#allocation2 + $0x8] sm:$0xff] %v475_v34  ;;  %v3074_v35 = vpack.c.bf16 %v475_v34, %v474_v31 }
  0xa4   : > { %v409_v37 = vpop.f32.mrf.mxu0 }
  0xa5   : > { %v410_v38 = vadd.f32 %v3056_v25, %v409_v37 }
  0xa7   : > { %v476_v39 = vmax.f32 %v410_v38, 0.0  ;;  %2420 = vmatmul.msk.bf16.gmra.mxu0 %vm352_vm0, %v2820_v36  ;;  %v3169_v36 = vld [vmem:[%s4108_s3 + $0x10] sm:$0xff] }
  0xa8   : > { %1225 = vmatpush.bf16.msrb.mxu1 %v3169_v36 }
  0xa9   : > { %504 = vst [vmem:[#allocation2 + $0x10] sm:$0xff] %v476_v39  ;;  %v748_v40 = vpack.c.bf16 %v476_v39, %v475_v34  ;;  %v3164_v34 = vld [vmem:[%s4108_s3 + $0x130] sm:$0xff] }
  0xaa   : > { %999 = vmatpush.bf16.msra.mxu2 %v3164_v34 }
  0xab   : > { %967 = vmatmul.bf16.vlgmr.msra.gmra.mxu1 %v748_v40 }
  0xac   : > { %v411_v41 = vpop.f32.mrf.mxu0 }
  0xad   : > { %v412_v42 = vadd.f32 %v3056_v25, %v411_v41  ;;  %v3181_v41 = vld [vmem:[%s4108_s3 + $0xa8] sm:$0xff] }
  0xae   : > { %1300 = vmatpush.bf16.msrb.mxu3 %v3181_v41 }
  0xaf   : > { %v477_v43 = vmax.f32 %v412_v42, 0.0  ;;  %v3186_v42 = vld [vmem:[%s4108_s3 + $0x128] sm:$0xff] }
  0xb0   : > { %v3085_v49 = vld [vmem:[#allocation2 + $0x9] sm:$0xff]  ;;  %1000 = vmatpush.bf16.msra.mxu2 %v3186_v42 }
  0xb1   : > { %505 = vst [vmem:[#allocation2 + $0x18] sm:$0xff] %v477_v43  ;;  %v3080_v44 = vpack.c.bf16 %v477_v43, %v476_v39 }
  0xb4   : > { %v414_v46 = vpop.f32.mrf.mxu0 }
  0xb5   : > { %v415_v47 = vadd.f32 %v3056_v25, %v414_v46 }
  0xb7   : > { %v478_v48 = vmax.f32 %v415_v47, 0.0  ;;  %2421 = vmatmul.msk.bf16.gmra.mxu0 %vm352_vm0, %v2821_v45  ;;  %v2824_v45 = vld [vmem:[%s2975_s29 + $0x68] sm:$0xff] }
  0xb8   : > { %v589_v50 = vld [vmem:[#allocation2 + $0x11] sm:$0xff] }
  0xb9   : > { %506 = vst [vmem:[#allocation2 + $0x20] sm:$0xff] %v478_v48  ;;  %v3088_v51 = vpack.c.bf16 %v589_v50, %v3085_v49  ;;  %v751_v52 = vpack.c.bf16 %v478_v48, %v477_v43  ;;  %v3191_v43 = vld [vmem:[%s4108_s3 + $0x8] sm:$0xff] }
  0xba   : > { %1226 = vmatpush.bf16.msrb.mxu1 %v3191_v43 }
  0xbb   : > { %4153 = vst [vmem:[#allocation11_spill] sm:$0xff] %v3088_v51  ;;  %1045 = vmatmul.bf16.vlgmr.msra.gmra.mxu3 %v3088_v51  ;;  %972 = vmatmul.bf16.gmra.mxu1 %v751_v52  ;;  %v3211_v52 = vld [vmem:[%s4108_s3] sm:$0xff] }
  0xbc   : > { %v416_v53 = vpop.f32.mrf.mxu0  ;;  %v3419_v51 = vld [vmem:[%s4108_s3 + $0x180] sm:$0xff] }
  0xbd   : > { %v417_v54 = vadd.f32 %v3056_v25, %v416_v53  ;;  %4172 = vst [vmem:[#allocation30_spill] sm:$0xff] %v3419_v51 }
  0xbe   : > { %1227 = vmatpush.bf16.msrb.mxu1 %v3211_v52 }
  0xbf   : > { %v479_v55 = vmax.f32 %v417_v54, 0.0 }
  0xc0   : > { %v590_v56 = vld [vmem:[#allocation2 + $0x19] sm:$0xff] }
  0xc1   : > { %507 = vst [vmem:[#allocation2 + $0x28] sm:$0xff] %v479_v55  ;;  %v3092_v57 = vpack.c.bf16 %v590_v56, %v589_v50  ;;  %v3094_v58 = vpack.c.bf16 %v479_v55, %v478_v48  ;;  %v3201_v48 = vld [vmem:[%s4108_s3 + $0xa0] sm:$0xff] }
  0xc2   : > { %v3206_v50 = vld [vmem:[%s4108_s3 + $0x120] sm:$0xff]  ;;  %1301 = vmatpush.bf16.msrb.mxu3 %v3201_v48 }
  0xc3   : > { %1001 = vmatpush.bf16.msra.mxu2 %v3206_v50 }
  0xc4   : > { %v419_v60 = vpop.f32.mrf.mxu0 }
  0xc5   : > { %v420_v61 = vadd.f32 %v3056_v25, %v419_v60  ;;  %v3227_v60 = vld [vmem:[%s4108_s3 + $0x118] sm:$0xff] }
  0xc7   : > { %v480_v62 = vmax.f32 %v420_v61, 0.0  ;;  %2422 = vmatmul.msk.bf16.gmra.mxu0 %vm352_vm0, %v2822_v59  ;;  %v3222_v59 = vld [vmem:[%s4108_s3 + $0x98] sm:$0xff]  ;;  %1002 = vmatpush.bf16.msra.mxu2 %v3227_v60 }
  0xc8   : > { %v591_v63 = vld [vmem:[#allocation2 + $0x21] sm:$0xff]  ;;  %1302 = vmatpush.bf16.msrb.mxu3 %v3222_v59 }
  0xc9   : > { %508 = vst [vmem:[#allocation2 + $0x30] sm:$0xff] %v480_v62  ;;  %v3099_v0 = vpack.c.bf16 %v591_v63, %v590_v56  ;;  %v754_v1 = vpack.c.bf16 %v480_v62, %v479_v55 }
  0xcb   : > { %4154 = vst [vmem:[#allocation12_spill] sm:$0xff] %v3099_v0  ;;  %1050 = vmatmul.bf16.gmra.mxu3 %v3099_v0  ;;  %977 = vmatmul.bf16.gmra.mxu1 %v754_v1  ;;  %v3241_v1 = vld [vmem:[%s4108_s3 + $0x110] sm:$0xff] }
  0xcc   : > { %v421_v3 = vpop.f32.mrf.mxu0  ;;  %1003 = vmatpush.bf16.msra.mxu2 %v3241_v1  ;;  %v3385_v0 = vld [vmem:[%s4108_s3 + $0x190] sm:$0xff] }
  0xcd   : > { %v422_v4 = vadd.f32 %v3056_v25, %v421_v3  ;;  %4169 = vst [vmem:[#allocation27_spill] sm:$0xff] %v3385_v0 }
  0xcf   : > { %v481_v6 = vmax.f32 %v422_v4, 0.0 }
  0xd0   : > { %v592_v7 = vld [vmem:[#allocation2 + $0x29] sm:$0xff] }
  0xd1   : > { %509 = vst [vmem:[#allocation2 + $0x38] sm:$0xff] %v481_v6  ;;  %v3115_v8 = vpack.c.bf16 %v592_v7, %v591_v63  ;;  %v3117_v9 = vpack.c.bf16 %v481_v6, %v480_v62  ;;  %v3236_v63 = vld [vmem:[%s4108_s3 + $0x90] sm:$0xff] }
  0xd2   : > { %1303 = vmatpush.bf16.msrb.mxu3 %v3236_v63 }
  0xd4   : > { %v424_v12 = vpop.f32.mrf.mxu0 }
  0xd5   : > { %v425_v13 = vadd.f32 %v3056_v25, %v424_v12  ;;  %v3257_v12 = vld [vmem:[%s4108_s3 + $0x108] sm:$0xff] }
  0xd6   : > { %1004 = vmatpush.bf16.msra.mxu2 %v3257_v12 }
  0xd7   : > { %v482_v17 = vmax.f32 %v425_v13, 0.0  ;;  %2423 = vmatmul.msk.bf16.gmra.mxu0 %vm352_vm0, %v2823_v11  ;;  %v3252_v11 = vld [vmem:[%s4108_s3 + $0x88] sm:$0xff] }
  0xd8   : > { %v593_v19 = vld [vmem:[#allocation2 + $0x31] sm:$0xff]  ;;  %1304 = vmatpush.bf16.msrb.mxu3 %v3252_v11 }
  0xd9   : > { %510 = vst [vmem:[#allocation2 + $0x40] sm:$0xff] %v482_v17  ;;  %v3134_v20 = vpack.c.bf16 %v593_v19, %v592_v7  ;;  %v757_v22 = vpack.c.bf16 %v482_v17, %v481_v6 }
  0xdb   : > { %4155 = vst [vmem:[#allocation13_spill] sm:$0xff] %v3134_v20  ;;  %1055 = vmatmul.bf16.gmra.mxu3 %v3134_v20  ;;  %982 = vmatmul.bf16.gmra.mxu1 %v757_v22  ;;  %v3270_v22 = vld [vmem:[%s4108_s3 + $0x100] sm:$0xff] }
  0xdc   : > { %v426_v31 = vpop.f32.mrf.mxu0  ;;  %1005 = vmatpush.bf16.msra.mxu2 %v3270_v22 }
  0xdd   : > { %v427_v32 = vadd.f32 %v3056_v25, %v426_v31 }
  0xdf   : > { %v483_v37 = vmax.f32 %v427_v32, 0.0 }
  0xe0   : > { %v594_v38 = vld [vmem:[#allocation2 + $0x39] sm:$0xff] }
  0xe1   : > { %511 = vst [vmem:[#allocation2 + $0x48] sm:$0xff] %v483_v37  ;;  %v3173_v39 = vpack.c.bf16 %v594_v38, %v593_v19  ;;  %v3176_v40 = vpack.c.bf16 %v483_v37, %v482_v17  ;;  %v3265_v19 = vld [vmem:[%s4108_s3 + $0x80] sm:$0xff] }
  0xe2   : > { %1305 = vmatpush.bf16.msrb.mxu3 %v3265_v19 }
  0xe4   : > { %v429_v46 = vpop.f32.mrf.mxu0 }
  0xe5   : > { %v430_v47 = vadd.f32 %v3056_v25, %v429_v46 }
  0xe7   : > { %v484_v53 = vmax.f32 %v430_v47, 0.0  ;;  %2424 = vmatmul.msk.bf16.gmra.mxu0 %vm352_vm0, %v2824_v45 }
  0xe8   : > { %v595_v54 = vld [vmem:[#allocation2 + $0x41] sm:$0xff] }
  0xe9   : > { %512 = vst [vmem:[#allocation2 + $0x50] sm:$0xff] %v484_v53  ;;  %v3216_v55 = vpack.c.bf16 %v595_v54, %v594_v38  ;;  %v760_v56 = vpack.c.bf16 %v484_v53, %v483_v37 }
  0xeb   : > { %4156 = vst [vmem:[#allocation14_spill] sm:$0xff] %v3216_v55  ;;  %1060 = vmatmul.bf16.gmra.mxu3 %v3216_v55  ;;  %987 = vmatmul.bf16.gmra.mxu1 %v760_v56 }
  0xec   : > { %v431_v61 = vpop.f32.mrf.mxu0 }
  0xed   : > { %v432_v62 = vadd.f32 %v3056_v25, %v431_v61  ;;  %v2843_v61 = vld [vmem:[%s4108_s3 + $0x78] sm:$0xff] }
  0xee   : > { %1259 = vmatpush.bf16.msrb.mxu2 %v2843_v61  ;;  %1978 = vmatpush.bf16.msra.mxu0 %v2843_v61 }
  0xef   : > { %v485_v3 = vmax.f32 %v432_v62, 0.0 }
  0xf0   : > { %v596_v4 = vld [vmem:[#allocation2 + $0x49] sm:$0xff] }
  0xf1   : > { %513 = vst [vmem:[#allocation2 + $0x58] sm:$0xff] %v485_v3  ;;  %v3245_v6 = vpack.c.bf16 %v596_v4, %v595_v54  ;;  %v3247_v7 = vpack.c.bf16 %v485_v3, %v484_v53 }
  0xf4   : > { %v434_v13 = vpop.f32.mrf.mxu0 }
  0xf5   : > { %v435_v17 = vadd.f32 %v3056_v25, %v434_v13 }
  0xf7   : > { %v486_v31 = vmax.f32 %v435_v17, 0.0 }
  0xf8   : > { %v597_v32 = vld [vmem:[#allocation2 + $0x51] sm:$0xff] }
  0xf9   : > { %514 = vst [vmem:[#allocation2 + $0x60] sm:$0xff] %v486_v31  ;;  %v3274_v37 = vpack.c.bf16 %v597_v32, %v596_v4  ;;  %v763_v38 = vpack.c.bf16 %v486_v31, %v485_v3 }
  0xfb   : > { %4157 = vst [vmem:[#allocation15_spill] sm:$0xff] %v3274_v37  ;;  %1065 = vmatmul.bf16.gmra.mxu3 %v3274_v37  ;;  %992 = vmatmul.bf16.gmra.mxu1 %v763_v38  ;;  %v3349_v37 = vld [vmem:[%s4108_s3 + $0x1a0] sm:$0xff] }
  0xfc   : > { %v436_v45 = vpop.f32.mrf.mxu0  ;;  %4165 = vst [vmem:[#allocation23_spill] sm:$0xff] %v3349_v37 }
  0xfd   : > { %v437_v46 = vadd.f32 %v3056_v25, %v436_v45 }
  0xff   : > { %v487_v47 = vmax.f32 %v437_v46, 0.0  ;;  %v2842_v46 = vld [vmem:[%s4108_s3 + $0x70] sm:$0xff] }
 0x100   : > { %v598_v53 = vld [vmem:[#allocation2 + $0x59] sm:$0xff]  ;;  %1260 = vmatpush.bf16.msrb.mxu2 %v2842_v46  ;;  %1979 = vmatpush.bf16.msra.mxu0 %v2842_v46 }
 0x101   : > { %515 = vst [vmem:[#allocation2 + $0x68] sm:$0xff] %v487_v47  ;;  %v3278_v54 = vpack.c.bf16 %v487_v47, %v486_v31  ;;  %v3280_v56 = vpack.c.bf16 %v598_v53, %v597_v32 }
 0x103   : > { %4158 = vst [vmem:[#allocation16_spill] sm:$0xff] %v3278_v54 }
 0x104   : > { %v439_v62 = vpop.f32.mrf.mxu0 }
 0x105   : > { %v440_v3 = vadd.f32 %v3056_v25, %v439_v62  ;;  %v587_v62 = vld [vmem:[#allocation2 + $0x1] sm:$0xff] }
 0x107   : > { %v488_v4 = vmax.f32 %v440_v3, 0.0 }
 0x108   : > { %v3286_v13 = vld [vmem:[#allocation2 + $0x61] sm:$0xff] }
 0x109   : > { %4159 = vst [vmem:[#allocation17_spill] sm:$0xff] %v3286_v13  ;;  %v3289_v17 = vpack.c.bf16 %v3286_v13, %v598_v53 }
 0x10a   : > { %516 = vst [vmem:[#allocation2 + $0x70] sm:$0xff] %v488_v4 }
 0x10b   : > { %4160 = vst [vmem:[#allocation18_spill] sm:$0xff] %v3289_v17  ;;  %1070 = vmatmul.bf16.gmra.mxu3 %v3289_v17  ;;  %1228 = vmatmul.bf16.vlgmr.msrb.gmra.mxu1 %v3074_v35  ;;  %v3301_v35 = vpack.c.bf16 %v3085_v49, %v587_v62 }
 0x10c   : > { %v441_v31 = vpop.f32.mrf.mxu0 }
 0x10d   : > { %v442_v32 = vadd.f32 %v3056_v25, %v441_v31 }
 0x10f   : > { %v489_v38 = vmax.f32 %v442_v32, 0.0 }
 0x111   : > { %517 = vst [vmem:[#allocation2 + $0x78] sm:$0xff] %v489_v38  ;;  %v3294_v45 = vpack.c.bf16 %v489_v38, %v488_v4  ;;  %v2841_v4 = vld [vmem:[%s4108_s3 + $0x68] sm:$0xff] }
 0x112   : > { %1261 = vmatpush.bf16.msrb.mxu2 %v2841_v4  ;;  %1980 = vmatpush.bf16.msra.mxu0 %v2841_v4 }
 0x114   : > { %v444_v47 = vpop.f32.mrf.mxu0 }
 0x115   : > { %v445_v53 = vadd.f32 %v3056_v25, %v444_v47 }
 0x117   : > { %v490_v61 = vmax.f32 %v445_v53, 0.0 }
 0x119   : > { %518 = vst [vmem:[#allocation2 + $0x80] sm:$0xff] %v490_v61  ;;  %v749_v3 = vpack.c.bf16 %v490_v61, %v489_v38 }
 0x11b   : > { %1306 = vmatmul.bf16.vlgmr.msrb.gmra.mxu3 %v3301_v35  ;;  %1006 = vmatmul.bf16.vlgmr.msra.gmra.mxu2 %v749_v3 }
 0x11c   : > { %v446_v31 = vpop.f32.mrf.mxu0  ;;  %1233 = vmatmul.bf16.gmra.mxu1 %v3080_v44  ;;  %1830 = vmatmul.bf16.vlgmr.msrb.gmra.mxu0 %v749_v3  ;;  %v2840_v3 = vld [vmem:[%s4108_s3 + $0x60] sm:$0xff] }
 0x11d   : > { %v447_v32 = vadd.f32 %v3056_v25, %v446_v31  ;;  %1262 = vmatpush.bf16.msrb.mxu2 %v2840_v3  ;;  %1981 = vmatpush.bf16.msra.mxu0 %v2840_v3  ;;  %v3342_v3 = vld [vmem:[%s4108_s3 + $0x1a8] sm:$0xff] }
 0x11e   : > { %4164 = vst [vmem:[#allocation22_spill] sm:$0xff] %v3342_v3 }
 0x11f   : > { %v491_v46 = vmax.f32 %v447_v32, 0.0 }
 0x121   : > { %519 = vst [vmem:[#allocation2 + $0x88] sm:$0xff] %v491_v46  ;;  %v3309_v49 = vpack.c.bf16 %v491_v46, %v490_v61  ;;  %v3321_v61 = vld [vmem:[%s4108_s3 + $0x1b8] sm:$0xff] }
 0x122   : > { %4161 = vst [vmem:[#allocation19_spill] sm:$0xff] %v3321_v61  ;;  %1584 = vmatpush.bf16.msra.mxu1 %v3321_v61 }
 0x124   : > { %v449_v38 = vpop.f32.mrf.mxu0 }
 0x125   : > { %v450_v47 = vadd.f32 %v3056_v25, %v449_v38 }
 0x127   : > { %v492_v53 = vmax.f32 %v450_v47, 0.0 }
 0x128   : > { %v3312_v62 = vpop.f32.mrf.mxu1 }
 0x129   : > { %520 = vst [vmem:[#allocation2 + $0x90] sm:$0xff] %v492_v53  ;;  %v752_v17 = vpack.c.bf16 %v492_v53, %v491_v46  ;;  %v3329_v46 = vld [vmem:[%s4108_s3 + $0x1b0] sm:$0xff] }
 0x12a   : > { %4162 = vst [vmem:[#allocation20_spill] sm:$0xff] %v3329_v46  ;;  %1585 = vmatpush.bf16.msra.mxu1 %v3329_v46 }
 0x12b   : > { %1311 = vmatmul.bf16.gmra.mxu3 %v3092_v57  ;;  %1011 = vmatmul.bf16.gmra.mxu2 %v752_v17 }
 0x12c   : > { %v451_v4 = vpop.f32.mrf.mxu0  ;;  %1238 = vmatmul.bf16.gmra.mxu1 %v3094_v58  ;;  %1835 = vmatmul.bf16.gmra.mxu0 %v752_v17  ;;  %v2839_v17 = vld [vmem:[%s4108_s3 + $0x58] sm:$0xff] }
 0x12d   : > { %v452_v31 = vadd.f32 %v3056_v25, %v451_v4  ;;  %1263 = vmatpush.bf16.msrb.mxu2 %v2839_v17  ;;  %1982 = vmatpush.bf16.msra.mxu0 %v2839_v17 }
 0x12e   : > { %1586 = vmatpush.bf16.msra.mxu1 %v3342_v3 }
 0x12f   : > { %v493_v32 = vmax.f32 %v452_v31, 0.0 }
 0x130   : > { %v3331_v38 = vpop.f32.mrf.mxu1  ;;  %v3353_v20 = vld [vmem:[#allocation2 + $0x89] sm:$0xff] }
 0x131   : > { %521 = vst [vmem:[#allocation2 + $0x98] sm:$0xff] %v493_v32  ;;  %v3333_v47 = vpack.c.bf16 %v493_v32, %v492_v53 }
 0x132   : > { %4166 = vst [vmem:[#allocation24_spill] sm:$0xff] %v3353_v20  ;;  %1587 = vmatpush.bf16.msra.mxu1 %v3349_v37  ;;  %v3380_v37 = vld [vmem:[%s4108_s3 + $0x230] sm:$0xff]  ;;  %v3404_v20 = vld [vmem:[%s4108_s3 + $0x188] sm:$0xff] }
 0x133   : > { %4163 = vst [vmem:[#allocation21_spill] sm:$0xff] %v3333_v47 }
 0x134   : > { %v454_v4 = vpop.f32.mrf.mxu0  ;;  %4171 = vst [vmem:[#allocation29_spill] sm:$0xff] %v3404_v20 }
 0x135   : > { %v455_v31 = vadd.f32 %v3056_v25, %v454_v4  ;;  %v3364_v4 = vld [vmem:[%s4108_s3 + $0x238] sm:$0xff] }
 0x136   : > { %1662 = vmatpush.bf16.msra.mxu3 %v3364_v4 }
 0x137   : > { %v494_v53 = vmax.f32 %v455_v31, 0.0  ;;  %v3369_v31 = vld [vmem:[%s4108_s3 + $0x198] sm:$0xff] }
 0x138   : > { %v3351_v55 = vpop.f32.mrf.mxu1  ;;  %v3355_v46 = vld [vmem:[#allocation2 + $0x91] sm:$0xff]  ;;  %4168 = vst [vmem:[#allocation26_spill] sm:$0xff] %v3369_v31  ;;  %1588 = vmatpush.bf16.msra.mxu1 %v3369_v31 }
 0x139   : > { %4167 = vst [vmem:[#allocation25_spill] sm:$0xff] %v3355_v46  ;;  %v755_v61 = vpack.c.bf16 %v494_v53, %v493_v32  ;;  %v2838_v31 = vld [vmem:[%s4108_s3 + $0x50] sm:$0xff] }
 0x13a   : > { %522 = vst [vmem:[#allocation2 + $0xa0] sm:$0xff] %v494_v53  ;;  %1663 = vmatpush.bf16.msra.mxu3 %v3380_v37  ;;  %1264 = vmatpush.bf16.msrb.mxu2 %v2838_v31 }
 0x13b   : > { %1316 = vmatmul.bf16.gmra.mxu3 %v3115_v8  ;;  %1016 = vmatmul.bf16.gmra.mxu2 %v755_v61 }
 0x13c   : > { %v456_v3 = vpop.f32.mrf.mxu0  ;;  %1243 = vmatmul.bf16.gmra.mxu1 %v3117_v9  ;;  %1840 = vmatmul.bf16.gmra.mxu0 %v755_v61 }
 0x13d   : > { %v457_v32 = vadd.f32 %v3056_v25, %v456_v3  ;;  %1589 = vmatpush.bf16.msra.mxu1 %v3385_v0  ;;  %1983 = vmatpush.bf16.msra.mxu0 %v2838_v31 }
 0x13e   : > { %v3375_v17 = vpop.f32.mrf.mxu3 }
 0x13f   : > { %v495_v46 = vmax.f32 %v457_v32, 0.0  ;;  %v3399_v32 = vld [vmem:[%s4108_s3 + $0x228] sm:$0xff] }
 0x140   : > { %v3387_v61 = vpop.f32.mrf.mxu1  ;;  %1664 = vmatpush.bf16.msra.mxu3 %v3399_v32 }
 0x141   : > { %523 = vst [vmem:[#allocation2 + $0xa8] sm:$0xff] %v495_v46  ;;  %v3389_v3 = vpack.c.bf16 %v495_v46, %v494_v53  ;;  %1590 = vmatpush.bf16.msra.mxu1 %v3404_v20 }
 0x143   : > { %4170 = vst [vmem:[#allocation28_spill] sm:$0xff] %v3389_v3 }
 0x144   : > { %v459_v53 = vpop.f32.mrf.mxu0  ;;  %1665 = vmatpush.bf16.msra.mxu3 %v3414_v24 }
 0x145   : > { %v460_v30 = vadd.f32 %v3056_v25, %v459_v53  ;;  %v3423_v53 = vld [vmem:[#allocation2 + $0x99] sm:$0xff]  ;;  %1591 = vmatpush.bf16.msra.mxu1 %v3419_v51 }
 0x146   : > { %v3409_v0 = vpop.f32.mrf.mxu3  ;;  %4174 = vst [vmem:[#allocation32_spill] sm:$0xff] %v3423_v53 }
 0x147   : > { %v496_v26 = vmax.f32 %v460_v30, 0.0  ;;  %v2837_v30 = vld [vmem:[%s4108_s3 + $0x48] sm:$0xff] }
 0x148   : > { %v3421_v31 = vpop.f32.mrf.mxu1  ;;  %v3425_v23 = vld [vmem:[#allocation2 + $0xa1] sm:$0xff]  ;;  %1265 = vmatpush.bf16.msrb.mxu2 %v2837_v30  ;;  %1984 = vmatpush.bf16.msra.mxu0 %v2837_v30 }
 0x149   : > { %4173 = vst [vmem:[#allocation31_spill] sm:$0xff] %v3421_v31  ;;  %v758_v20 = vpack.c.bf16 %v496_v26, %v495_v46  ;;  %1861 = vmatpush.bf16.msrb.mxu1 %v3144_v28  ;;  %v3439_v46 = vld [vmem:[%s4108_s3 + $0x218] sm:$0xff] }
 0x14a   : > { %4175 = vst [vmem:[#allocation33_spill] sm:$0xff] %v3425_v23  ;;  %1666 = vmatpush.bf16.msra.mxu3 %v3439_v46  ;;  %v3450_v23 = vld [vmem:[%s4108_s3 + $0x210] sm:$0xff] }
 0x14b   : > { %524 = vst [vmem:[#allocation2 + $0xb0] sm:$0xff] %v496_v26  ;;  %1321 = vmatmul.bf16.gmra.mxu3 %v3173_v39  ;;  %1021 = vmatmul.bf16.gmra.mxu2 %v758_v20 }
 0x14c   : > { %v461_v21 = vpop.f32.mrf.mxu0  ;;  %1248 = vmatmul.bf16.gmra.mxu1 %v3176_v40  ;;  %1845 = vmatmul.bf16.gmra.mxu0 %v758_v20 }
 0x14d   : > { %v462_v18 = vadd.f32 %v3056_v25, %v461_v21  ;;  %1862 = vmatpush.bf16.msrb.mxu1 %v3164_v34  ;;  %v3460_v21 = vld [vmem:[%s4108_s3 + $0x208] sm:$0xff] }
 0x14e   : > { %v3444_v13 = vpop.f32.mrf.mxu3  ;;  %1667 = vmatpush.bf16.msra.mxu3 %v3450_v23 }
 0x14f   : > { %v497_v28 = vmax.f32 %v462_v18, 0.0  ;;  %v2921_v18 = vmov 0.0  }
 0x150   : > { %v3452_v51 = vpop.f32.mrf.mxu1  ;;  %530 = vst [vmem:[#allocation2 + $0xe0] sm:$0xff] %v2921_v18 }
 0x151   : > { %4176 = vst [vmem:[#allocation34_spill] sm:$0xff] %v3452_v51  ;;  %v3454_v20 = vpack.c.bf16 %v497_v28, %v496_v26  ;;  %1863 = vmatpush.bf16.msrb.mxu1 %v3186_v42  ;;  %v2836_v26 = vld [vmem:[%s4108_s3 + $0x40] sm:$0xff] }
 0x152   : > { %525 = vst [vmem:[#allocation2 + $0xb8] sm:$0xff] %v497_v28  ;;  %1668 = vmatpush.bf16.msra.mxu3 %v3460_v21  ;;  %v3473_v51 = vld [vmem:[%s4108_s3 + $0x200] sm:$0xff]  ;;  %1266 = vmatpush.bf16.msrb.mxu2 %v2836_v26 }
 0x153   : > { %4177 = vst [vmem:[#allocation35_spill] sm:$0xff] %v3454_v20  ;;  %1985 = vmatpush.bf16.msra.mxu0 %v2836_v26 }
 0x154   : > { %v464_v34 = vpop.f32.mrf.mxu0 }
 0x155   : > { %v465_v30 = vadd.f32 %v3056_v25, %v464_v34  ;;  %1864 = vmatpush.bf16.msrb.mxu1 %v3206_v50  ;;  %v3478_v34 = vld [vmem:[#allocation2 + $0xa9] sm:$0xff] }
 0x156   : > { %v3465_v53 = vpop.f32.mrf.mxu3  ;;  %1669 = vmatpush.bf16.msra.mxu3 %v3473_v51 }
 0x157   : > { %v498_v42 = vmax.f32 %v465_v30, 0.0  ;;  %2188 = vmatpush.bf16.msrb.mxu0 %v3364_v4  ;;  %v2891_v4 = vld [vmem:[%s4108_s3 + $0x1f8] sm:$0xff] }
 0x158   : > { %v3476_v18 = vpop.f32.mrf.mxu1  ;;  %1623 = vmatpush.bf16.msra.mxu2 %v2891_v4 }
 0x159   : > { %v3480_v31 = vld [vmem:[#allocation2 + $0xb1] sm:$0xff]  ;;  %526 = vst [vmem:[#allocation2 + $0xc0] sm:$0xff] %v498_v42  ;;  %v761_v16 = vpack.c.bf16 %v498_v42, %v497_v28  ;;  %1865 = vmatpush.bf16.msrb.mxu1 %v3227_v60 }
 0x15a   : > { %1939 = vmatpush.bf16.msrb.mxu3 %v3104_v2 }
 0x15b   : > { %1326 = vmatmul.bf16.gmra.mxu3 %v3245_v6  ;;  %1026 = vmatmul.bf16.gmra.mxu2 %v761_v16 }
 0x15c   : > { %v466_v50 = vpop.f32.mrf.mxu0  ;;  %1253 = vmatmul.bf16.gmra.mxu1 %v3247_v7  ;;  %1850 = vmatmul.bf16.gmra.mxu0 %v761_v16 }
 0x15d   : > { %v467_v28 = vadd.f32 %v3056_v25, %v466_v50  ;;  %2189 = vmatpush.bf16.msrb.mxu0 %v3380_v37  ;;  %1866 = vmatpush.bf16.msrb.mxu1 %v3241_v1 }
 0x15e   : > { %v3492_v30 = vpop.f32.mrf.mxu3  ;;  %1940 = vmatpush.bf16.msrb.mxu3 %v3112_v5 }
 0x15f   : > { %v499_v2 = vmax.f32 %v467_v28, 0.0 }
 0x160   : > { %v3499_v60 = vpop.f32.mrf.mxu1  ;;  %v3514_v50 = vld [vmem:[#allocation2 + $0xb9] sm:$0xff] }
 0x161   : > { %527 = vst [vmem:[#allocation2 + $0xc8] sm:$0xff] %v499_v2  ;;  %v3501_v16 = vpack.c.bf16 %v499_v2, %v498_v42  ;;  %2190 = vmatpush.bf16.msrb.mxu0 %v3399_v32  ;;  %1867 = vmatpush.bf16.msrb.mxu1 %v3257_v12 }
 0x162   : > { %1941 = vmatpush.bf16.msrb.mxu3 %v3122_v10 }
 0x163   : > { %4178 = vst [vmem:[#allocation36_spill] sm:$0xff] %v3501_v16 }
 0x164   : > { %v469_v37 = vpop.f32.mrf.mxu0 }
 0x165   : > { %v470_v26 = vadd.f32 %v3056_v25, %v469_v37  ;;  %2191 = vmatpush.bf16.msrb.mxu0 %v3414_v24  ;;  %1868 = vmatpush.bf16.msrb.mxu1 %v3270_v22 }
 0x166   : > { %v3508_v5 = vpop.f32.mrf.mxu3  ;;  %1942 = vmatpush.bf16.msrb.mxu3 %v3130_v15 }
 0x167   : > { %v500_v1 = vmax.f32 %v470_v26, 0.0 }
 0x168   : > { %v3512_v42 = vpop.f32.mrf.mxu1  ;;  %v3516_v32 = vld [vmem:[#allocation2 + $0xc1] sm:$0xff] }
 0x169   : > { %528 = vst [vmem:[#allocation2 + $0xd0] sm:$0xff] %v500_v1  ;;  %v764_v10 = vpack.c.bf16 %v500_v1, %v499_v2  ;;  %2192 = vmatpush.bf16.msrb.mxu0 %v3439_v46  ;;  %v2890_v46 = vld [vmem:[%s4108_s3 + $0x1f0] sm:$0xff] }
 0x16a   : > { %1943 = vmatpush.bf16.msrb.mxu3 %v3149_v29  ;;  %1624 = vmatpush.bf16.msra.mxu2 %v2890_v46 }
 0x16b   : > { %1331 = vmatmul.bf16.gmra.mxu3 %v3280_v56  ;;  %1031 = vmatmul.bf16.gmra.mxu2 %v764_v10 }
 0x16c   : > { %v471_v15 = vpop.f32.mrf.mxu0  ;;  %1592 = vmatmul.bf16.vlgmr.msra.gmra.mxu1 %v3080_v44  ;;  %1855 = vmatmul.bf16.gmra.mxu0 %v764_v10 }
 0x16d   : > { %v472_v12 = vadd.f32 %v3056_v25, %v471_v15  ;;  %2193 = vmatpush.bf16.msrb.mxu0 %v3450_v23  ;;  %2017 = vmatpush.bf16.msra.mxu1 %v3139_v27  ;;  %v2889_v25 = vld [vmem:[%s4108_s3 + $0x1e8] sm:$0xff] }
 0x16e   : > { %v3527_v22 = vpop.f32.mrf.mxu3  ;;  %1944 = vmatpush.bf16.msrb.mxu3 %v3169_v36  ;;  %1625 = vmatpush.bf16.msra.mxu2 %v2889_v25 }
 0x16f   : > { %v501_v29 = vmax.f32 %v472_v12, 0.0 }
 0x170   : > { %v3533_v28 = vpop.f32.mrf.mxu1  ;;  %v3550_v36 = vld [vmem:[#allocation2 + $0xc9] sm:$0xff] }
 0x171   : > { %529 = vst [vmem:[#allocation2 + $0xd8] sm:$0xff] %v501_v29  ;;  %v3535_v44 = vpack.c.bf16 %v501_v29, %v500_v1  ;;  %2194 = vmatpush.bf16.msrb.mxu0 %v3460_v21  ;;  %2018 = vmatpush.bf16.msra.mxu1 %v3159_v33 }
 0x172   : > { %1945 = vmatpush.bf16.msrb.mxu3 %v3191_v43 }
 0x173   : > { %4179 = vst [vmem:[#allocation37_spill] sm:$0xff] %v3535_v44 }
 0x175   : > { %2195 = vmatpush.bf16.msrb.mxu0 %v3473_v51  ;;  %2019 = vmatpush.bf16.msra.mxu1 %v3181_v41  ;;  %v4202_v51 = vld [vmem:[#allocation23_spill] sm:$0xff] }
 0x176   : > { %v3542_v23 = vpop.f32.mrf.mxu3  ;;  %1946 = vmatpush.bf16.msrb.mxu3 %v3211_v52 }
 0x178   : > { %v3548_v27 = vpop.f32.mrf.mxu1  ;;  %v3552_v33 = vld [vmem:[#allocation2 + $0xd1] sm:$0xff] }
 0x179   : > { %2020 = vmatpush.bf16.msra.mxu1 %v3201_v48 }
 0x17b   : > { %1670 = vmatmul.bf16.vlgmr.msra.gmra.mxu3 %v3092_v57  ;;  %1267 = vmatmul.bf16.vlgmr.msrb.gmra.mxu2 %v3294_v45 }
 0x17c   : > { %1597 = vmatmul.bf16.gmra.mxu1 %v3094_v58  ;;  %1986 = vmatmul.bf16.vlgmr.msra.gmra.mxu0 %v3301_v35  ;;  %v2888_v58 = vld [vmem:[%s4108_s3 + $0x1e0] sm:$0xff] }
 0x17d   : > { %2149 = vmatpush.bf16.msra.mxu3 %v2891_v4  ;;  %2021 = vmatpush.bf16.msra.mxu1 %v3222_v59 }
 0x17e   : > { %v3562_v41 = vpop.f32.mrf.mxu3  ;;  %1626 = vmatpush.bf16.msra.mxu2 %v2888_v58 }
 0x180   : > { %v3564_v43 = vpop.f32.mrf.mxu1 }
 0x181   : > { %2150 = vmatpush.bf16.msra.mxu3 %v2890_v46  ;;  %2022 = vmatpush.bf16.msra.mxu1 %v3236_v63  ;;  %v2887_v63 = vld [vmem:[%s4108_s3 + $0x1d8] sm:$0xff] }
 0x182   : > { %1627 = vmatpush.bf16.msra.mxu2 %v2887_v63 }
 0x185   : > { %2151 = vmatpush.bf16.msra.mxu3 %v2889_v25  ;;  %2023 = vmatpush.bf16.msra.mxu1 %v3252_v11 }
 0x186   : > { %v3568_v48 = vpop.f32.mrf.mxu3 }
 0x188   : > { %v1229_v52 = vpop.f32.mrf.mxu1 }
 0x189   : > { %2152 = vmatpush.bf16.msra.mxu3 %v2888_v58  ;;  %2024 = vmatpush.bf16.msra.mxu1 %v3265_v19  ;;  %v2886_v19 = vld [vmem:[%s4108_s3 + $0x1d0] sm:$0xff] }
 0x18a   : > { %1628 = vmatpush.bf16.msra.mxu2 %v2886_v19 }
 0x18b   : > { %1675 = vmatmul.bf16.gmra.mxu3 %v3115_v8  ;;  %1272 = vmatmul.bf16.gmra.mxu2 %v3309_v49 }
 0x18c   : > { %1602 = vmatmul.bf16.gmra.mxu1 %v3117_v9  ;;  %1991 = vmatmul.bf16.gmra.mxu0 %v3092_v57 }
 0x18d   : > { %2153 = vmatpush.bf16.msra.mxu3 %v2887_v63  ;;  %v2884_v63 = vld [vmem:[%s4108_s3 + $0x1c0] sm:$0xff] }
 0x18e   : > { %v3578_v59 = vpop.f32.mrf.mxu3 }
 0x190   : > { %v1231_v11 = vpop.f32.mrf.mxu1 }
 0x191   : > { %2154 = vmatpush.bf16.msra.mxu3 %v2886_v19 }
 0x196   : > { %v3583_v35 = vpop.f32.mrf.mxu3 }
 0x199   : > { %v1234_v21 = vpop.f32.mrf.mxu1 }
 0x19b   : > { %1680 = vmatmul.bf16.gmra.mxu3 %v3173_v39  ;;  %1277 = vmatmul.bf16.gmra.mxu2 %v3333_v47 }
 0x19c   : > { %1607 = vmatmul.bf16.gmra.mxu1 %v3176_v40  ;;  %1996 = vmatmul.bf16.gmra.mxu0 %v3115_v8  ;;  %v2885_v40 = vld [vmem:[%s4108_s3 + $0x1c8] sm:$0xff] }
 0x19d   : > { %1629 = vmatpush.bf16.msra.mxu2 %v2885_v40  ;;  %2155 = vmatpush.bf16.msra.mxu3 %v2885_v40 }
 0x19e   : > { %v1007_v9 = vpop.f32.mrf.mxu2  ;;  %v3593_v2 = vpop.f32.mrf.mxu3 }
 0x19f   : > { %v1008_v4 = vadd.f32 %v1007_v9, %v3312_v62  ;;  %v3629_v9 = vpop.f32.mrf.mxu0 }
 0x1a0   : > { %4181 = vst [vmem:[#allocation16_spill] sm:$0xff] %v3629_v9  ;;  %v628_v9 = vld [vmem:[#allocation2 + $0xd9] sm:$0xff] }
 0x1a1   : > { %v1047_v37 = vadd.f32 %v3375_v17, %v1008_v4  ;;  %v1236_v15 = vpop.f32.mrf.mxu1  ;;  %1630 = vmatpush.bf16.msra.mxu2 %v2884_v63  ;;  %2156 = vmatpush.bf16.msra.mxu3 %v2884_v63  ;;  %v4183_v4 = vld [vmem:[#allocation31_spill] sm:$0xff] }
 0x1a3   : > { %v3596_v26 = vadd.f32 %v1229_v52, %v1047_v37 }
 0x1a5   : > { %1900 = vmatpush.bf16.msrb.mxu2 %v3006_v14 }
 0x1a6   : > { %v1009_v1 = vpop.f32.mrf.mxu2  ;;  %v3603_v12 = vpop.f32.mrf.mxu3 }
 0x1a7   : > { %v1010_v10 = vadd.f32 %v1009_v1, %v3331_v38  ;;  %v4184_v1 = vld [vmem:[#allocation5_spill] sm:$0xff] }
 0x1a9   : > { %v1049_v62 = vadd.f32 %v3409_v0, %v1010_v10  ;;  %v1239_v25 = vpop.f32.mrf.mxu1  ;;  %v4185_v10 = vld [vmem:[#allocation6_spill] sm:$0xff] }
 0x1ab   : > { %1685 = vmatmul.bf16.gmra.mxu3 %v3245_v6  ;;  %1282 = vmatmul.bf16.gmra.mxu2 %v3389_v3  ;;  %v3607_v17 = vadd.f32 %v1231_v11, %v1049_v62 }
 0x1ac   : > { %1612 = vmatmul.bf16.gmra.mxu1 %v3247_v7  ;;  %2001 = vmatmul.bf16.gmra.mxu0 %v3173_v39 }
 0x1ae   : > { %v1012_v46 = vpop.f32.mrf.mxu2  ;;  %v3615_v0 = vpop.f32.mrf.mxu3 }
 0x1af   : > { %v1013_v38 = vadd.f32 %v1012_v46, %v3351_v55  ;;  %v3640_v46 = vpop.f32.mrf.mxu0 }
 0x1b1   : > { %v1052_v29 = vadd.f32 %v3444_v13, %v1013_v38  ;;  %v4180_v13 = vmov %v3278_v54  ;;  %v1241_v19 = vpop.f32.mrf.mxu1 }
 0x1b3   : > { %v3613_v58 = vadd.f32 %v1234_v21, %v1052_v29  ;;  %v4187_v29 = vld [vmem:[#allocation34_spill] sm:$0xff] }
 0x1b6   : > { %v1014_v52 = vpop.f32.mrf.mxu2  ;;  %v3632_v21 = vpop.f32.mrf.mxu3 }
 0x1b7   : > { %v1015_v11 = vadd.f32 %v1014_v52, %v3387_v61  ;;  %v4182_v61 = vld [vmem:[#allocation4_spill] sm:$0xff] }
 0x1b8   : > { %1901 = vmatpush.bf16.msrb.mxu2 %v4182_v61  ;;  %4186 = vst [vmem:[#allocation4_spill] sm:$0xff] %v3640_v46  ;;  %v4190_v61 = vld [vmem:[#allocation11_spill] sm:$0xff] }
 0x1b9   : > { %v1054_v7 = vadd.f32 %v3465_v53, %v1015_v11  ;;  %v1244_v38 = vpop.f32.mrf.mxu1  ;;  %v4188_v11 = vld [vmem:[#allocation17_spill] sm:$0xff] }
 0x1bb   : > { %1690 = vmatmul.bf16.gmra.mxu3 %v3280_v56  ;;  %1287 = vmatmul.bf16.gmra.mxu2 %v3454_v20  ;;  %v3625_v55 = vadd.f32 %v1236_v15, %v1054_v7  ;;  %v600_v15 = vld [vmem:[#allocation2 + $0x69] sm:$0xff] }
 0x1bc   : > { %1617 = vmatmul.bf16.gmra.mxu1 %v4180_v13  ;;  %2006 = vmatmul.bf16.gmra.mxu0 %v3245_v6  ;;  %v3646_v7 = vpack.c.bf16 %v600_v15, %v4188_v11  ;;  %v4189_v13 = vld [vmem:[#allocation7_spill] sm:$0xff] }
 0x1bd   : > { %1902 = vmatpush.bf16.msrb.mxu2 %v4184_v1 }
 0x1be   : > { %v1017_v53 = vpop.f32.mrf.mxu2  ;;  %v3643_v63 = vpop.f32.mrf.mxu3 }
 0x1bf   : > { %v1018_v14 = vadd.f32 %v1017_v53, %v4183_v4  ;;  %v4191_v53 = vld [vmem:[#allocation8_spill] sm:$0xff] }
 0x1c1   : > { %v1057_v37 = vadd.f32 %v3492_v30, %v1018_v14  ;;  %1903 = vmatpush.bf16.msrb.mxu2 %v4185_v10  ;;  %v4193_v10 = vld [vmem:[#allocation9_spill] sm:$0xff] }
 0x1c3   : > { %v3637_v40 = vadd.f32 %v1239_v25, %v1057_v37  ;;  %v3658_v37 = vpop.f32.mrf.mxu0 }
 0x1c4   : > { %4192 = vst [vmem:[#allocation31_spill] sm:$0xff] %v3658_v37 }
 0x1c5   : > { %1904 = vmatpush.bf16.msrb.mxu2 %v4189_v13 }
 0x1c6   : > { %v1019_v62 = vpop.f32.mrf.mxu2  ;;  %v3662_v15 = vpop.f32.mrf.mxu3 }
 0x1c7   : > { %v1020_v52 = vadd.f32 %v1019_v62, %v4187_v29  ;;  %v4194_v62 = vld [vmem:[#allocation10_spill] sm:$0xff] }
 0x1c9   : > { %v1059_v30 = vadd.f32 %v3508_v5, %v1020_v52  ;;  %1905 = vmatpush.bf16.msrb.mxu2 %v4191_v53  ;;  %v1246_v5 = vpop.f32.mrf.mxu1 }
 0x1cb   : > { %1695 = vmatmul.bf16.gmra.mxu3 %v3646_v7  ;;  %1292 = vmatmul.bf16.gmra.mxu2 %v3501_v16  ;;  %v3652_v25 = vadd.f32 %v1241_v19, %v1059_v30  ;;  %v3669_v30 = vld [vmem:[#allocation2 + $0x81] sm:$0xff] }
 0x1cc   : > { %1869 = vmatmul.bf16.vlgmr.msrb.gmra.mxu1 %v4190_v61  ;;  %2011 = vmatmul.bf16.gmra.mxu0 %v3280_v56 }
 0x1cd   : > { %1906 = vmatpush.bf16.msrb.mxu2 %v4193_v10  ;;  %v4199_v10 = vld [vmem:[#allocation20_spill] sm:$0xff] }
 0x1ce   : > { %v1022_v4 = vpop.f32.mrf.mxu2  ;;  %v3681_v53 = vpop.f32.mrf.mxu3 }
 0x1cf   : > { %v1023_v14 = vadd.f32 %v1022_v4, %v3476_v18  ;;  %v4195_v18 = vld [vmem:[#allocation24_spill] sm:$0xff] }
 0x1d0   : > { %v3673_v13 = vpack.c.bf16 %v4195_v18, %v3669_v30 }
 0x1d1   : > { %v1062_v1 = vadd.f32 %v3527_v22, %v1023_v14  ;;  %1907 = vmatpush.bf16.msrb.mxu2 %v4194_v62  ;;  %v3675_v22 = vpop.f32.mrf.mxu0  ;;  %v1249_v61 = vpop.f32.mrf.mxu1 }
 0x1d2   : > { %4196 = vst [vmem:[#allocation5_spill] sm:$0xff] %v3675_v22  ;;  %v4220_v22 = vld [vmem:[#allocation18_spill] sm:$0xff] }
 0x1d3   : > { %v3664_v19 = vadd.f32 %v1244_v38, %v1062_v1 }
 0x1d6   : > { %v1024_v29 = vpop.f32.mrf.mxu2 }
 0x1d7   : > { %v1025_v52 = vadd.f32 %v1024_v29, %v3499_v60  ;;  %v4197_v60 = vld [vmem:[#allocation12_spill] sm:$0xff]  ;;  %v4201_v29 = vld [vmem:[#allocation22_spill] sm:$0xff] }
 0x1d9   : > { %v1064_v11 = vadd.f32 %v3542_v23, %v1025_v52  ;;  %v4198_v23 = vld [vmem:[#allocation19_spill] sm:$0xff]  ;;  %v3691_v62 = vpop.f32.mrf.mxu0  ;;  %v3694_v52 = vpop.f32.mrf.mxu3 }
 0x1da   : > { %4200 = vst [vmem:[#allocation6_spill] sm:$0xff] %v3691_v62  ;;  %v4212_v62 = vld [vmem:[#allocation33_spill] sm:$0xff] }
 0x1db   : > { %1947 = vmatmul.bf16.vlgmr.msrb.gmra.mxu3 %v3294_v45  ;;  %1631 = vmatmul.bf16.vlgmr.msra.gmra.mxu2 %v3309_v49  ;;  %v3679_v38 = vadd.f32 %v1246_v5, %v1064_v11  ;;  %v1251_v5 = vpop.f32.mrf.mxu1 }
 0x1dc   : > { %1874 = vmatmul.bf16.gmra.mxu1 %v4197_v60  ;;  %2196 = vmatmul.bf16.vlgmr.msrb.gmra.mxu0 %v3673_v13 }
 0x1dd   : > { %2110 = vmatpush.bf16.msra.mxu2 %v4198_v23 }
 0x1de   : > { %v1027_v4 = vpop.f32.mrf.mxu2 }
 0x1df   : > { %v1028_v14 = vadd.f32 %v1027_v4, %v3512_v42  ;;  %v4203_v42 = vld [vmem:[#allocation25_spill] sm:$0xff] }
 0x1e1   : > { %v1067_v1 = vadd.f32 %v3562_v41, %v1028_v14  ;;  %2111 = vmatpush.bf16.msra.mxu2 %v4199_v10  ;;  %v4204_v41 = vld [vmem:[#allocation32_spill] sm:$0xff]  ;;  %v4205_v14 = vld [vmem:[#allocation13_spill] sm:$0xff]  ;;  %v3713_v10 = vpop.f32.mrf.mxu3 }
 0x1e2   : > { %v3701_v4 = vpack.c.bf16 %v4204_v41, %v4203_v42 }
 0x1e3   : > { %v3689_v45 = vadd.f32 %v1249_v61, %v1067_v1  ;;  %v4206_v1 = vld [vmem:[#allocation26_spill] sm:$0xff] }
 0x1e5   : > { %2112 = vmatpush.bf16.msra.mxu2 %v4201_v29  ;;  %v1254_v29 = vpop.f32.mrf.mxu1 }
 0x1e6   : > { %v1029_v11 = vpop.f32.mrf.mxu2 }
 0x1e7   : > { %v1030_v60 = vadd.f32 %v1029_v11, %v3533_v28 }
 0x1e9   : > { %v1069_v23 = vadd.f32 %v3568_v48, %v1030_v60  ;;  %2113 = vmatpush.bf16.msra.mxu2 %v4202_v51  ;;  %v3710_v48 = vpop.f32.mrf.mxu0  ;;  %v4208_v60 = vld [vmem:[#allocation27_spill] sm:$0xff] }
 0x1ea   : > { %4207 = vst [vmem:[#allocation34_spill] sm:$0xff] %v3710_v48  ;;  %v4211_v48 = vld [vmem:[#allocation30_spill] sm:$0xff] }
 0x1eb   : > { %1952 = vmatmul.bf16.gmra.mxu3 %v3309_v49  ;;  %1636 = vmatmul.bf16.gmra.mxu2 %v3333_v47  ;;  %v3705_v61 = vadd.f32 %v1251_v5, %v1069_v23  ;;  %v4209_v23 = vld [vmem:[#allocation29_spill] sm:$0xff] }
 0x1ec   : > { %1879 = vmatmul.bf16.gmra.mxu1 %v4205_v14  ;;  %2201 = vmatmul.bf16.gmra.mxu0 %v3701_v4 }
 0x1ed   : > { %2114 = vmatpush.bf16.msra.mxu2 %v4206_v1 }
 0x1ee   : > { %v1032_v28 = vpop.f32.mrf.mxu2 }
 0x1ef   : > { %v1033_v51 = vadd.f32 %v1032_v28, %v3548_v27  ;;  %v3725_v27 = vpop.f32.mrf.mxu3  ;;  %v1256_v28 = vpop.f32.mrf.mxu1 }
 0x1f1   : > { %v1072_v11 = vadd.f32 %v3578_v59, %v1033_v51  ;;  %2115 = vmatpush.bf16.msra.mxu2 %v4208_v60  ;;  %v3721_v1 = vpop.f32.mrf.mxu0  ;;  %v3729_v59 = vpack.c.bf16 %v3478_v34, %v4212_v62 }
 0x1f2   : > { %4210 = vst [vmem:[#allocation17_spill] sm:$0xff] %v3721_v1 }
 0x1f3   : > { %v3717_v5 = vadd.f32 %v1254_v29, %v1072_v11 }
 0x1f5   : > { %2116 = vmatpush.bf16.msra.mxu2 %v4209_v23  ;;  %v4216_v23 = vld [vmem:[#allocation15_spill] sm:$0xff] }
 0x1f6   : > { %v1034_v14 = vpop.f32.mrf.mxu2 }
 0x1f7   : > { %v1035_v24 = vadd.f32 %v1034_v14, %v3564_v43  ;;  %v4213_v43 = vld [vmem:[#allocation14_spill] sm:$0xff]  ;;  %v3742_v29 = vpop.f32.mrf.mxu3  ;;  %v3757_v14 = vpop.f32.mrf.mxu1 }
 0x1f8   : > { %4215 = vst [vmem:[#allocation11_spill] sm:$0xff] %v3742_v29 }
 0x1f9   : > { %v1074_v54 = vadd.f32 %v3583_v35, %v1035_v24  ;;  %2117 = vmatpush.bf16.msra.mxu2 %v4211_v48  ;;  %v3740_v48 = vpop.f32.mrf.mxu0 }
 0x1fa   : > { %4214 = vst [vmem:[#allocation7_spill] sm:$0xff] %v3740_v48 }
 0x1fb   : > { %1957 = vmatmul.bf16.gmra.mxu3 %v3333_v47  ;;  %1641 = vmatmul.bf16.gmra.mxu2 %v3389_v3  ;;  %v3733_v51 = vadd.f32 %v1256_v28, %v1074_v54  ;;  %v3749_v54 = vpack.c.bf16 %v3514_v50, %v3480_v31 }
 0x1fc   : > { %1884 = vmatmul.bf16.gmra.mxu1 %v4213_v43  ;;  %2206 = vmatmul.bf16.gmra.mxu0 %v3729_v59 }
 0x1fe   : > { %v1268_v24 = vpop.f32.mrf.mxu2 }
 0x1ff   : > { %v3738_v35 = vadd.f32 %v1268_v24, %v3596_v26  ;;  %v3759_v28 = vpop.f32.mrf.mxu3 }
 0x200   : > { %4218 = vst [vmem:[#allocation9_spill] sm:$0xff] %v3759_v28 }
 0x201   : > { %v3755_v26 = vpop.f32.mrf.mxu0 }
 0x202   : > { %4217 = vst [vmem:[#allocation8_spill] sm:$0xff] %v3755_v26  ;;  %v3773_v26 = vpack.c.bf16 %v3550_v36, %v3516_v32 }
 0x206   : > { %v1270_v11 = vpop.f32.mrf.mxu2 }
 0x207   : > { %v3745_v60 = vadd.f32 %v1270_v11, %v3607_v17  ;;  %v3764_v11 = vpop.f32.mrf.mxu1 }
 0x209   : > { %v3769_v1 = vpop.f32.mrf.mxu0 }
 0x20a   : > { %4219 = vst [vmem:[#allocation10_spill] sm:$0xff] %v3769_v1 }
 0x20b   : > { %1962 = vmatmul.bf16.gmra.mxu3 %v3389_v3  ;;  %1646 = vmatmul.bf16.gmra.mxu2 %v3454_v20  ;;  %v615_v3 = vld [vmem:[#allocation2 + $0x71] sm:$0xff] }
 0x20c   : > { %1889 = vmatmul.bf16.gmra.mxu1 %v4216_v23  ;;  %2211 = vmatmul.bf16.gmra.mxu0 %v3749_v54  ;;  %v1671_v23 = vpop.f32.mrf.mxu3 }
 0x20e   : > { %v1273_v17 = vpop.f32.mrf.mxu2 }
 0x20f   : > { %v3762_v43 = vadd.f32 %v1273_v17, %v3613_v58 }
 0x214   : > { %v1673_v1 = vpop.f32.mrf.mxu3 }
 0x216   : > { %v1275_v24 = vpop.f32.mrf.mxu2 }
 0x217   : > { %v3767_v48 = vadd.f32 %v1275_v24, %v3625_v55  ;;  %v3782_v55 = vpop.f32.mrf.mxu1  ;;  %v3784_v24 = vpop.f32.mrf.mxu0 }
 0x218   : > { %4221 = vst [vmem:[#allocation24_spill] sm:$0xff] %v3784_v24 }
 0x21b   : > { %1967 = vmatmul.bf16.gmra.mxu3 %v3454_v20  ;;  %1651 = vmatmul.bf16.gmra.mxu2 %v3501_v16  ;;  %v616_v20 = vld [vmem:[#allocation2 + $0x79] sm:$0xff] }
 0x21c   : > { %1894 = vmatmul.bf16.gmra.mxu1 %v4220_v22  ;;  %2216 = vmatmul.bf16.gmra.mxu0 %v3773_v26  ;;  %v1785_v28 = vpack.c.bf16 %v616_v20, %v615_v3  ;;  %v2109_v22 = vpack.c.bf16 %v628_v9, %v3552_v33 }
 0x21e   : > { %v1278_v58 = vpop.f32.mrf.mxu2 }
 0x21f   : > { %v3780_v17 = vadd.f32 %v1278_v58, %v3637_v40  ;;  %v3790_v29 = vpop.f32.mrf.mxu1  ;;  %v3794_v40 = vpop.f32.mrf.mxu0 }
 0x220   : > { %4222 = vst [vmem:[#allocation12_spill] sm:$0xff] %v3794_v40  ;;  %v1676_v58 = vpop.f32.mrf.mxu3 }
 0x226   : > { %v1280_v37 = vpop.f32.mrf.mxu2 }
 0x227   : > { %v3787_v46 = vadd.f32 %v1280_v37, %v3652_v25  ;;  %v3799_v37 = vpop.f32.mrf.mxu1 }
 0x228   : > { %v1678_v3 = vpop.f32.mrf.mxu3 }
 0x22b   : > { %1972 = vmatmul.bf16.gmra.mxu3 %v3501_v16  ;;  %1656 = vmatmul.bf16.gmra.mxu2 %v3535_v44  ;;  %v1806_v16 = vpack.c.bf16 %v3669_v30, %v616_v20 }
 0x22c   : > { %2025 = vmatmul.bf16.vlgmr.msra.gmra.mxu1 %v1785_v28  ;;  %2221 = vmatmul.bf16.gmra.mxu0 %v2109_v22 }
 0x22e   : > { %v1283_v24 = vpop.f32.mrf.mxu2 }
 0x22f   : > { %v3797_v25 = vadd.f32 %v1283_v24, %v3664_v19  ;;  %v3807_v22 = vpop.f32.mrf.mxu1 }
 0x230   : > { %v3812_v24 = vpop.f32.mrf.mxu3 }
 0x236   : > { %v1285_v47 = vpop.f32.mrf.mxu2 }
 0x237   : > { %v3802_v9 = vadd.f32 %v1285_v47, %v3679_v38  ;;  %v3817_v47 = vpop.f32.mrf.mxu1 }
 0x238   : > { %v3819_v20 = vpop.f32.mrf.mxu3 }
 0x23b   : > { %2157 = vmatmul.bf16.vlgmr.msra.gmra.mxu3 %v3092_v57  ;;  %1908 = vmatmul.bf16.vlgmr.msrb.gmra.mxu2 %v1806_v16  ;;  %v4223_v57 = vpack.c.bf16 %v4203_v42, %v4195_v18 }
 0x23c   : > { %2030 = vmatmul.bf16.gmra.mxu1 %v3673_v13 }
 0x23e   : > { %v1288_v28 = vpop.f32.mrf.mxu2 }
 0x23f   : > { %v3810_v19 = vadd.f32 %v1288_v28, %v3689_v45  ;;  %v3829_v13 = vpop.f32.mrf.mxu1 }
 0x240   : > { %v3831_v38 = vpop.f32.mrf.mxu3 }
 0x246   : > { %v1290_v40 = vpop.f32.mrf.mxu2 }
 0x247   : > { %v3815_v44 = vadd.f32 %v1290_v40, %v3705_v61  ;;  %v3841_v18 = vpop.f32.mrf.mxu1  ;;  %v1308_v40 = vadd.f32 %v3593_v2, %v3738_v35 }
 0x248   : > { %v3843_v42 = vpop.f32.mrf.mxu3 }
 0x24b   : > { %2162 = vmatmul.bf16.gmra.mxu3 %v3115_v8  ;;  %1913 = vmatmul.bf16.gmra.mxu2 %v4223_v57  ;;  %v4224_v8 = vpack.c.bf16 %v4212_v62, %v4204_v41 }
 0x24c   : > { %2035 = vmatmul.bf16.gmra.mxu1 %v3701_v4 }
 0x24e   : > { %v1293_v16 = vpop.f32.mrf.mxu2 }
 0x24f   : > { %v3827_v30 = vadd.f32 %v1293_v16, %v3717_v5  ;;  %v3854_v41 = vpop.f32.mrf.mxu1 }
 0x256   : > { %v1295_v45 = vpop.f32.mrf.mxu2 }
 0x257   : > { %v3834_v61 = vadd.f32 %v1295_v45, %v3733_v51 }
 0x25b   : > { %2167 = vmatmul.bf16.gmra.mxu3 %v3173_v39  ;;  %1918 = vmatmul.bf16.gmra.mxu2 %v4224_v8  ;;  %v3851_v39 = vld [vmem:[%s4109_s4] ss:$0 sm:$0xff] }
 0x25c   : > { %2040 = vmatmul.bf16.gmra.mxu1 %v3729_v59  ;;  %v3856_v59 = vpop.f32.mrf.mxu3 }
 0x25e   : > { %v1632_v4 = vpop.f32.mrf.mxu2 }
 0x25f   : > { %v1633_v5 = vadd.f32 %v1632_v4, %v3757_v14  ;;  %v1310_v14 = vadd.f32 %v3603_v12, %v3745_v60  ;;  %v1313_v12 = vadd.f32 %v3615_v0, %v3762_v43  ;;  %v3872_v60 = vpop.f32.mrf.mxu1  ;;  %v4226_v43 = vpack.c.bf16 %v3516_v32, %v3514_v50 }
 0x261   : > { %v1672_v51 = vadd.f32 %v1671_v23, %v1633_v5  ;;  %v4225_v23 = vpack.c.bf16 %v3480_v31, %v3478_v34 }
 0x263   : > { %v1701_v28 = vadd.f32 %v1672_v51, %v1308_v40  ;;  %v1315_v51 = vadd.f32 %v3632_v21, %v3767_v48 }
 0x264   : > { %v3874_v40 = vpop.f32.mrf.mxu3 }
 0x265   : > { %v1717_v2 = vadd.f32 %v3851_v39, %v1701_v28 }
 0x266   : > { %v1634_v57 = vpop.f32.mrf.mxu2 }
 0x267   : > { %v1635_v62 = vadd.f32 %v1634_v57, %v3764_v11  ;;  %v1729_v8 = vmax.f32 %v1717_v2, 0.0 }
 0x269   : > { %v1674_v16 = vadd.f32 %v1673_v1, %v1635_v62 }
 0x26b   : > { %2172 = vmatmul.bf16.gmra.mxu3 %v3245_v6  ;;  %v1702_v35 = vadd.f32 %v1674_v16, %v1310_v14  ;;  %1923 = vmatmul.bf16.gmra.mxu2 %v4225_v23 }
 0x26c   : > { %2045 = vmatmul.bf16.gmra.mxu1 %v3749_v54  ;;  %v3886_v57 = vpop.f32.mrf.mxu3 }
 0x26d   : > { %v1718_v11 = vadd.f32 %v3851_v39, %v1702_v35  ;;  %v1320_v35 = vadd.f32 %v3662_v15, %v3787_v46  ;;  %v3911_v46 = vpop.f32.mrf.mxu0  ;;  %v1323_v15 = vadd.f32 %v3681_v53, %v3797_v25 }
 0x26e   : > { %v1637_v45 = vpop.f32.mrf.mxu2 }
 0x26f   : > { %v1730_v4 = vmax.f32 %v1718_v11, 0.0  ;;  %v1638_v5 = vadd.f32 %v1637_v45, %v3782_v55 }
 0x271   : > { %v3870_v1 = vmax.f32 %v1729_v8, %v1730_v4  ;;  %v1677_v6 = vadd.f32 %v1676_v58, %v1638_v5  ;;  %v3884_v58 = vpop.f32.mrf.mxu1 }
 0x273   : > { %v1703_v31 = vadd.f32 %v1677_v6, %v1313_v12  ;;  %v1325_v6 = vadd.f32 %v3694_v52, %v3802_v9  ;;  %v1328_v52 = vadd.f32 %v3713_v10, %v3810_v19 }
 0x274   : > { %v3896_v16 = vpop.f32.mrf.mxu3 }
 0x275   : > { %v1719_v55 = vadd.f32 %v3851_v39, %v1703_v31 }
 0x276   : > { %v1639_v34 = vpop.f32.mrf.mxu2 }
 0x277   : > { %v1640_v54 = vadd.f32 %v1639_v34, %v3790_v29  ;;  %v1731_v21 = vmax.f32 %v1719_v55, 0.0  ;;  %v3924_v34 = vpop.f32.mrf.mxu0 }
 0x279   : > { %v1679_v28 = vadd.f32 %v1678_v3, %v1640_v54 }
 0x27b   : > { %2177 = vmatmul.bf16.gmra.mxu3 %v3280_v56  ;;  %v1704_v0 = vadd.f32 %v1679_v28, %v1315_v51  ;;  %1928 = vmatmul.bf16.gmra.mxu2 %v4226_v43  ;;  %v1318_v56 = vadd.f32 %v3643_v63, %v3780_v17  ;;  %v4227_v17 = vpack.c.bf16 %v3552_v33, %v3550_v36  ;;  %v1870_v36 = vpop.f32.mrf.mxu1 }
 0x27c   : > { %2050 = vmatmul.bf16.gmra.mxu1 %v3773_v26  ;;  %v3909_v4 = vpop.f32.mrf.mxu3 }
 0x27d   : > { %v1720_v29 = vadd.f32 %v3851_v39, %v1704_v0 }
 0x27e   : > { %v1642_v62 = vpop.f32.mrf.mxu2 }
 0x27f   : > { %v1732_v48 = vmax.f32 %v1720_v29, 0.0  ;;  %v1643_v3 = vadd.f32 %v1642_v62, %v3799_v37  ;;  %v3937_v29 = vpop.f32.mrf.mxu0 }
 0x281   : > { %v3893_v14 = vmax.f32 %v1731_v21, %v1732_v48  ;;  %v1682_v50 = vadd.f32 %v3812_v24, %v1643_v3  ;;  %v1330_v48 = vadd.f32 %v3725_v27, %v3815_v44  ;;  %v4228_v3 = vld [vmem:[#allocation21_spill] sm:$0xff]  ;;  %v4229_v44 = vld [vmem:[#allocation11_spill] sm:$0xff] }
 0x282   : > { %v1333_v27 = vadd.f32 %v4229_v44, %v3827_v30 }
 0x283   : > { %v1705_v32 = vadd.f32 %v1682_v50, %v1318_v56 }
 0x284   : > { %v3922_v31 = vpop.f32.mrf.mxu3 }
 0x285   : > { %v1721_v37 = vadd.f32 %v3851_v39, %v1705_v32 }
 0x286   : > { %v1644_v2 = vpop.f32.mrf.mxu2 }
 0x287   : > { %v1645_v26 = vadd.f32 %v1644_v2, %v3807_v22  ;;  %v1733_v45 = vmax.f32 %v1721_v37, 0.0  ;;  %v3948_v32 = vpop.f32.mrf.mxu0 }
 0x289   : > { %v1684_v23 = vadd.f32 %v3819_v20, %v1645_v26 }
 0x28b   : > { %2182 = vmatmul.bf16.gmra.mxu3 %v3646_v7  ;;  %v1706_v63 = vadd.f32 %v1684_v23, %v1320_v35  ;;  %1933 = vmatmul.bf16.gmra.mxu2 %v4227_v17 }
 0x28c   : > { %v3935_v43 = vpop.f32.mrf.mxu3 }
 0x28d   : > { %v1722_v24 = vadd.f32 %v3851_v39, %v1706_v63 }
 0x28e   : > { %v1647_v11 = vpop.f32.mrf.mxu2 }
 0x28f   : > { %v1734_v8 = vmax.f32 %v1722_v24, 0.0  ;;  %v1648_v22 = vadd.f32 %v1647_v11, %v3817_v47  ;;  %v3959_v11 = vpop.f32.mrf.mxu0 }
 0x291   : > { %v3915_v7 = vmax.f32 %v1733_v45, %v1734_v8  ;;  %v1687_v20 = vadd.f32 %v3831_v38, %v1648_v22  ;;  %v1872_v38 = vpop.f32.mrf.mxu1  ;;  %v4230_v45 = vld [vmem:[#allocation9_spill] sm:$0xff] }
 0x292   : > { %v1335_v8 = vadd.f32 %v4230_v45, %v3834_v61 }
 0x293   : > { %v1707_v33 = vadd.f32 %v1687_v20, %v1323_v15  ;;  %v4231_v20 = vld [vmem:[#allocation28_spill] sm:$0xff] }
 0x294   : > { %v3946_v56 = vpop.f32.mrf.mxu3 }
 0x295   : > { %v1723_v53 = vadd.f32 %v3851_v39, %v1707_v33 }
 0x296   : > { %v1649_v5 = vpop.f32.mrf.mxu2 }
 0x297   : > { %v1650_v12 = vadd.f32 %v1649_v5, %v3829_v13  ;;  %v1735_v28 = vmax.f32 %v1723_v53, 0.0 }
 0x299   : > { %v1689_v47 = vadd.f32 %v3843_v42, %v1650_v12 }
 0x29b   : > { %v1708_v25 = vadd.f32 %v1689_v47, %v1325_v6  ;;  %2118 = vmatmul.bf16.vlgmr.msra.gmra.mxu2 %v3309_v49  ;;  %v1875_v49 = vpop.f32.mrf.mxu1 }
 0x29c   : > { %v3957_v24 = vpop.f32.mrf.mxu3 }
 0x29d   : > { %v1724_v54 = vadd.f32 %v3851_v39, %v1708_v25 }
 0x29e   : > { %v1652_v51 = vpop.f32.mrf.mxu2 }
 0x29f   : > { %v1736_v13 = vmax.f32 %v1724_v54, 0.0  ;;  %v1653_v55 = vadd.f32 %v1652_v51, %v3841_v18  ;;  %v4234_v54 = vld [vmem:[#allocation4_spill] sm:$0xff] }
 0x2a0   : > { %v1873_v51 = vadd.f32 %v1872_v38, %v4234_v54 }
 0x2a1   : > { %v3932_v9 = vmax.f32 %v1735_v28, %v1736_v13  ;;  %v1692_v42 = vadd.f32 %v3856_v59, %v1653_v55 }
 0x2a3   : > { %v1709_v0 = vadd.f32 %v1692_v42, %v1328_v52  ;;  %v1877_v35 = vpop.f32.mrf.mxu1  ;;  %v4236_v42 = vld [vmem:[#allocation31_spill] sm:$0xff] }
 0x2a4   : > { %v3972_v61 = vpop.f32.mrf.mxu3 }
 0x2a5   : > { %v1725_v10 = vadd.f32 %v3851_v39, %v1709_v0  ;;  %v1876_v0 = vadd.f32 %v1875_v49, %v4236_v42 }
 0x2a6   : > { %v1654_v62 = vpop.f32.mrf.mxu2 }
 0x2a7   : > { %v1655_v21 = vadd.f32 %v1654_v62, %v3854_v41  ;;  %v1737_v2 = vmax.f32 %v1725_v10, 0.0 }
 0x2a9   : > { %v1694_v18 = vadd.f32 %v3874_v40, %v1655_v21 }
 0x2ab   : > { %v1710_v19 = vadd.f32 %v1694_v18, %v1330_v48  ;;  %2123 = vmatmul.bf16.gmra.mxu2 %v4228_v3  ;;  %v1880_v22 = vpop.f32.mrf.mxu1  ;;  %v4237_v18 = vld [vmem:[#allocation5_spill] sm:$0xff] }
 0x2ac   : > { %v3980_v55 = vpop.f32.mrf.mxu3  ;;  %v1878_v10 = vadd.f32 %v1877_v35, %v4237_v18 }
 0x2ad   : > { %v1726_v59 = vadd.f32 %v3851_v39, %v1710_v19 }
 0x2ae   : > { %v1657_v50 = vpop.f32.mrf.mxu2 }
 0x2af   : > { %v1738_v26 = vmax.f32 %v1726_v59, 0.0  ;;  %v1658_v41 = vadd.f32 %v1657_v50, %v3872_v60 }
 0x2b1   : > { %v3953_v40 = vmax.f32 %v1737_v2, %v1738_v26  ;;  %v1697_v23 = vadd.f32 %v3886_v57, %v1658_v41  ;;  %v4232_v57 = vld [vmem:[#allocation16_spill] sm:$0xff]  ;;  %v4239_v26 = vld [vmem:[#allocation6_spill] sm:$0xff] }
 0x2b2   : > { %v1871_v33 = vadd.f32 %v1870_v36, %v4232_v57  ;;  %v4235_v36 = vld [vmem:[#allocation35_spill] sm:$0xff]  ;;  %v4238_v2 = vld [vmem:[#allocation36_spill] sm:$0xff]  ;;  %v1881_v41 = vadd.f32 %v1880_v22, %v4239_v26 }
 0x2b3   : > { %v1711_v37 = vadd.f32 %v1697_v23, %v1333_v27  ;;  %v1882_v25 = vpop.f32.mrf.mxu1 }
 0x2b4   : > { %v3988_v19 = vpop.f32.mrf.mxu3 }
 0x2b5   : > { %v1727_v30 = vadd.f32 %v3851_v39, %v1711_v37  ;;  %v4240_v37 = vld [vmem:[#allocation34_spill] sm:$0xff] }
 0x2b6   : > { %v1659_v63 = vpop.f32.mrf.mxu2 }
 0x2b7   : > { %v1660_v17 = vadd.f32 %v1659_v63, %v3884_v58  ;;  %v1739_v12 = vmax.f32 %v1727_v30, 0.0  ;;  %v1883_v63 = vadd.f32 %v1882_v25, %v4240_v37  ;;  %v4241_v30 = vld [vmem:[#allocation37_spill] sm:$0xff]  ;;  %v4247_v37 = vld [vmem:[#allocation24_spill] sm:$0xff] }
 0x2b9   : > { %v1699_v60 = vadd.f32 %v3896_v16, %v1660_v17  ;;  %v3974_v16 = vpop.f32.mrf.mxu0 }
 0x2bb   : > { %v1712_v15 = vadd.f32 %v1699_v60, %v1335_v8  ;;  %2128 = vmatmul.bf16.gmra.mxu2 %v4231_v20  ;;  %v1885_v62 = vpop.f32.mrf.mxu1 }
 0x2bc   : > { %v3998_v27 = vpop.f32.mrf.mxu3 }
 0x2bd   : > { %v1728_v5 = vadd.f32 %v3851_v39, %v1712_v15  ;;  %v4242_v15 = vld [vmem:[#allocation17_spill] sm:$0xff] }
 0x2be   : > { %v1909_v58 = vpop.f32.mrf.mxu2  ;;  %v1886_v20 = vadd.f32 %v1885_v62, %v4242_v15 }
 0x2bf   : > { %v1740_v6 = vmax.f32 %v1728_v5, 0.0  ;;  %v3968_v47 = vadd.f32 %v1909_v58, %v1871_v33 }
 0x2c1   : > { %v3970_v53 = vmax.f32 %v1739_v12, %v1740_v6  ;;  %v3982_v52 = vpop.f32.mrf.mxu0  ;;  %v4243_v12 = vld [vmem:[#allocation7_spill] sm:$0xff] }
 0x2c3   : > { %4233 = vst [vmem:[#allocation19_spill] sm:$0xff] %v3970_v53  ;;  %v1887_v50 = vpop.f32.mrf.mxu1 }
 0x2c4   : > { %v4005_v8 = vpop.f32.mrf.mxu3  ;;  %v1888_v6 = vadd.f32 %v1887_v50, %v4243_v12 }
 0x2c6   : > { %v1911_v28 = vpop.f32.mrf.mxu2 }
 0x2c7   : > { %v3977_v13 = vadd.f32 %v1911_v28, %v1873_v51  ;;  %v4244_v28 = vld [vmem:[#allocation8_spill] sm:$0xff] }
 0x2c9   : > { %v3990_v3 = vpop.f32.mrf.mxu0 }
 0x2cb   : > { %2133 = vmatmul.bf16.gmra.mxu2 %v4235_v36  ;;  %v1890_v35 = vpop.f32.mrf.mxu1 }
 0x2cc   : > { %v4013_v5 = vpop.f32.mrf.mxu3  ;;  %v1891_v36 = vadd.f32 %v1890_v35, %v4244_v28 }
 0x2ce   : > { %v1914_v21 = vpop.f32.mrf.mxu2 }
 0x2cf   : > { %v3985_v48 = vadd.f32 %v1914_v21, %v1876_v0 }
 0x2d1   : > { %v4000_v23 = vpop.f32.mrf.mxu0 }
 0x2d3   : > { %v1892_v22 = vpop.f32.mrf.mxu1 }
 0x2d4   : > { %v4021_v42 = vpop.f32.mrf.mxu3 }
 0x2d6   : > { %v1916_v38 = vpop.f32.mrf.mxu2 }
 0x2d7   : > { %v3992_v59 = vadd.f32 %v1916_v38, %v1878_v10  ;;  %v4246_v10 = vld [vmem:[#allocation10_spill] sm:$0xff] }
 0x2d8   : > { %v1893_v38 = vadd.f32 %v1892_v22, %v4246_v10 }
 0x2d9   : > { %v4007_v60 = vpop.f32.mrf.mxu0 }
 0x2db   : > { %2138 = vmatmul.bf16.gmra.mxu2 %v4238_v2  ;;  %v1895_v25 = vpop.f32.mrf.mxu1 }
 0x2dc   : > { %v2158_v50 = vpop.f32.mrf.mxu3 }
 0x2de   : > { %v1919_v44 = vpop.f32.mrf.mxu2 }
 0x2df   : > { %v3996_v49 = vadd.f32 %v1919_v44, %v1881_v41 }
 0x2e1   : > { %v4015_v58 = vpop.f32.mrf.mxu0 }
 0x2e3   : > { %v1897_v18 = vpop.f32.mrf.mxu1 }
 0x2e6   : > { %v1921_v17 = vpop.f32.mrf.mxu2 }
 0x2e7   : > { %v4003_v45 = vadd.f32 %v1921_v17, %v1883_v63  ;;  %v1896_v63 = vadd.f32 %v1895_v25, %v4247_v37 }
 0x2e9   : > { %v4023_v21 = vpop.f32.mrf.mxu0 }
 0x2ea   : > { %4245 = vst [vmem:[#allocation20_spill] sm:$0xff] %v4023_v21 }
 0x2eb   : > { %2143 = vmatmul.bf16.gmra.mxu2 %v4241_v30  ;;  %v2026_v44 = vpop.f32.mrf.mxu1  ;;  %v2160_v30 = vpop.f32.mrf.mxu3 }
 0x2ee   : > { %v1924_v57 = vpop.f32.mrf.mxu2 }
 0x2ef   : > { %v4011_v33 = vadd.f32 %v1924_v57, %v1886_v20  ;;  %v4248_v57 = vld [vmem:[#allocation12_spill] sm:$0xff] }
 0x2f0   : > { %v1898_v12 = vadd.f32 %v1897_v18, %v4248_v57 }
 0x2f1   : > { %v2197_v41 = vpop.f32.mrf.mxu0 }
 0x2f3   : > { %v2028_v20 = vpop.f32.mrf.mxu1  ;;  %v2163_v22 = vpop.f32.mrf.mxu3 }
 0x2f6   : > { %v1926_v54 = vpop.f32.mrf.mxu2 }
 0x2f7   : > { %v4018_v51 = vadd.f32 %v1926_v54, %v1888_v6 }
 0x2f9   : > { %v2199_v15 = vpop.f32.mrf.mxu0 }
 0x2fe   : > { %v1929_v0 = vpop.f32.mrf.mxu2 }
 0x2ff   : > { %v4025_v62 = vadd.f32 %v1929_v0, %v1891_v36  ;;  %v1949_v36 = vadd.f32 %v3909_v4, %v3968_v47  ;;  %v2031_v0 = vpop.f32.mrf.mxu1 }
 0x301   : > { %v2202_v28 = vpop.f32.mrf.mxu0  ;;  %v1988_v25 = vadd.f32 %v3911_v46, %v1949_v36  ;;  %v1954_v46 = vadd.f32 %v3935_v43, %v3985_v48 }
 0x306   : > { %v1931_v2 = vpop.f32.mrf.mxu2 }
 0x307   : > { %v4028_v26 = vadd.f32 %v1931_v2, %v1893_v38  ;;  %v1951_v2 = vadd.f32 %v3922_v31, %v3977_v13  ;;  %v2033_v21 = vpop.f32.mrf.mxu1 }
 0x309   : > { %v1990_v18 = vadd.f32 %v3924_v34, %v1951_v2 }
 0x30b   : > { %v2029_v4 = vadd.f32 %v2028_v20, %v1990_v18 }
 0x30e   : > { %v1934_v17 = vpop.f32.mrf.mxu2 }
 0x30f   : > { %v4031_v35 = vadd.f32 %v1934_v17, %v1896_v63  ;;  %v2027_v63 = vadd.f32 %v2026_v44, %v1988_v25  ;;  %v2165_v17 = vpop.f32.mrf.mxu3  ;;  %v2036_v20 = vpop.f32.mrf.mxu1 }
 0x316   : > { %v1936_v6 = vpop.f32.mrf.mxu2 }
 0x317   : > { %v4034_v54 = vadd.f32 %v1936_v6, %v1898_v12  ;;  %v2204_v12 = vpop.f32.mrf.mxu0  ;;  %v2168_v36 = vpop.f32.mrf.mxu3 }
 0x31e   : > { %v2119_v10 = vpop.f32.mrf.mxu2 }
 0x31f   : > { %v2159_v38 = vadd.f32 %v2158_v50, %v2119_v10 }
 0x321   : > { %v2198_v37 = vadd.f32 %v2197_v41, %v2159_v38  ;;  %v2207_v38 = vpop.f32.mrf.mxu0 }
 0x323   : > { %v2227_v6 = vadd.f32 %v2198_v37, %v2027_v63 }
 0x325   : > { %v2239_v50 = vadd.f32 %v3851_v39, %v2227_v6 }
 0x326   : > { %v2121_v57 = vpop.f32.mrf.mxu2 }
 0x327   : > { %v2161_v53 = vadd.f32 %v2160_v30, %v2121_v57  ;;  %v2251_v34 = vmax.f32 %v2239_v50, 0.0  ;;  %v1993_v30 = vadd.f32 %v3937_v29, %v1954_v46 }
 0x329   : > { %v2200_v47 = vadd.f32 %v2199_v15, %v2161_v53  ;;  %v1956_v53 = vadd.f32 %v3946_v56, %v3992_v59  ;;  %v2032_v25 = vadd.f32 %v2031_v0, %v1993_v30  ;;  %v2170_v59 = vpop.f32.mrf.mxu3  ;;  %v2209_v63 = vpop.f32.mrf.mxu0 }
 0x32b   : > { %v2228_v10 = vadd.f32 %v2200_v47, %v2029_v4  ;;  %v2038_v4 = vpop.f32.mrf.mxu1 }
 0x32d   : > { %v2240_v31 = vadd.f32 %v3851_v39, %v2228_v10 }
 0x32e   : > { %v2124_v13 = vpop.f32.mrf.mxu2 }
 0x32f   : > { %v2252_v41 = vmax.f32 %v2240_v31, 0.0  ;;  %v2164_v44 = vadd.f32 %v2163_v22, %v2124_v13  ;;  %v1995_v22 = vadd.f32 %v3948_v32, %v1956_v53 }
 0x331   : > { %v2263_v15 = vmax.f32 %v2251_v34, %v2252_v41  ;;  %v2203_v48 = vadd.f32 %v2202_v28, %v2164_v44  ;;  %v2034_v18 = vadd.f32 %v2033_v21, %v1995_v22  ;;  %v1961_v21 = vadd.f32 %v3972_v61, %v4003_v45  ;;  %v2173_v31 = vpop.f32.mrf.mxu3  ;;  %v2212_v13 = vpop.f32.mrf.mxu0 }
 0x333   : > { %v2269_v43 = vmax.f32 %v3870_v1, %v2263_v15  ;;  %v2229_v29 = vadd.f32 %v2203_v48, %v2032_v25  ;;  %v1959_v1 = vadd.f32 %v3957_v24, %v3996_v49  ;;  %v2000_v34 = vadd.f32 %v3974_v16, %v1961_v21  ;;  %v2041_v49 = vpop.f32.mrf.mxu1 }
 0x335   : > { %2275 = vst [vmem:[%s4053_s22] sm:$0xff] %v2269_v43  ;;  %v2241_v57 = vadd.f32 %v3851_v39, %v2229_v29 }
 0x336   : > { %v2126_v2 = vpop.f32.mrf.mxu2 }
 0x337   : > { %v2166_v37 = vadd.f32 %v2165_v17, %v2126_v2  ;;  %v2253_v47 = vmax.f32 %v2241_v57, 0.0  ;;  %v1998_v17 = vadd.f32 %v3959_v11, %v1959_v1  ;;  %v1966_v2 = vadd.f32 %v3988_v19, %v4018_v51 }
 0x339   : > { %v2205_v56 = vadd.f32 %v2204_v12, %v2166_v37  ;;  %v2037_v24 = vadd.f32 %v2036_v20, %v1998_v17  ;;  %v2175_v45 = vpop.f32.mrf.mxu3  ;;  %v2214_v16 = vpop.f32.mrf.mxu0  ;;  %v1971_v17 = vadd.f32 %v4005_v8, %v4028_v26 }
 0x33b   : > { %v2230_v6 = vadd.f32 %v2205_v56, %v2034_v18  ;;  %v2043_v22 = vpop.f32.mrf.mxu1 }
 0x33d   : > { %v2242_v28 = vadd.f32 %v3851_v39, %v2230_v6 }
 0x33e   : > { %v2129_v32 = vpop.f32.mrf.mxu2 }
 0x33f   : > { %v2254_v0 = vmax.f32 %v2242_v28, 0.0  ;;  %v2169_v50 = vadd.f32 %v2168_v36, %v2129_v32  ;;  %v2039_v36 = vadd.f32 %v2038_v4, %v2000_v34 }
 0x341   : > { %v2264_v12 = vmax.f32 %v2253_v47, %v2254_v0  ;;  %v2208_v46 = vadd.f32 %v2207_v38, %v2169_v50  ;;  %v2178_v57 = vpop.f32.mrf.mxu3  ;;  %v2217_v6 = vpop.f32.mrf.mxu0 }
 0x343   : > { %v2270_v10 = vmax.f32 %v3893_v14, %v2264_v12  ;;  %v2231_v44 = vadd.f32 %v2208_v46, %v2037_v24  ;;  %v1964_v14 = vadd.f32 %v3980_v55, %v4011_v33  ;;  %v2005_v55 = vadd.f32 %v3990_v3, %v1966_v2  ;;  %v2046_v28 = vpop.f32.mrf.mxu1 }
 0x345   : > { %2276 = vst [vmem:[%s4053_s22 + $0x8] sm:$0xff] %v2270_v10  ;;  %v2243_v11 = vadd.f32 %v3851_v39, %v2231_v44  ;;  %v2003_v25 = vadd.f32 %v3982_v52, %v1964_v14  ;;  %v2044_v4 = vadd.f32 %v2043_v22, %v2005_v55 }
 0x346   : > { %v2131_v41 = vpop.f32.mrf.mxu2 }
 0x347   : > { %v2171_v30 = vadd.f32 %v2170_v59, %v2131_v41  ;;  %v2255_v43 = vmax.f32 %v2243_v11, 0.0  ;;  %v2042_v33 = vadd.f32 %v2041_v49, %v2003_v25 }
 0x349   : > { %v2210_v53 = vadd.f32 %v2209_v63, %v2171_v30  ;;  %v2180_v12 = vpop.f32.mrf.mxu3  ;;  %v2219_v10 = vpop.f32.mrf.mxu0 }
 0x34b   : > { %v2232_v15 = vadd.f32 %v2210_v53, %v2039_v36 }
 0x34d   : > { %v2244_v61 = vadd.f32 %v3851_v39, %v2232_v15 }
 0x34e   : > { %v2134_v38 = vpop.f32.mrf.mxu2 }
 0x34f   : > { %v2256_v20 = vmax.f32 %v2244_v61, 0.0  ;;  %v2174_v48 = vadd.f32 %v2173_v31, %v2134_v38 }
 0x351   : > { %v2265_v29 = vmax.f32 %v2255_v43, %v2256_v20  ;;  %v2213_v18 = vadd.f32 %v2212_v13, %v2174_v48  ;;  %v2048_v13 = vpop.f32.mrf.mxu1  ;;  %v2183_v8 = vpop.f32.mrf.mxu3  ;;  %v4249_v20 = vld [vmem:[#allocation20_spill] sm:$0xff] }
 0x352   : > { %v2222_v26 = vpop.f32.mrf.mxu0 }
 0x353   : > { %v2271_v37 = vmax.f32 %v3915_v7, %v2265_v29  ;;  %v2233_v59 = vadd.f32 %v2213_v18, %v2042_v33  ;;  %v1969_v7 = vadd.f32 %v3998_v27, %v4025_v62  ;;  %v2010_v27 = vadd.f32 %v4007_v60, %v1971_v17 }
 0x355   : > { %2277 = vst [vmem:[%s4053_s22 + $0x10] sm:$0xff] %v2271_v37  ;;  %v2245_v52 = vadd.f32 %v3851_v39, %v2233_v59  ;;  %v2008_v50 = vadd.f32 %v4000_v23, %v1969_v7  ;;  %v2049_v41 = vadd.f32 %v2048_v13, %v2010_v27  ;;  %v4250_v59 = vld [vmem:[#allocation19_spill] sm:$0xff] }
 0x356   : > { %v2136_v56 = vpop.f32.mrf.mxu2 }
 0x357   : > { %v2176_v63 = vadd.f32 %v2175_v45, %v2136_v56  ;;  %v2257_v51 = vmax.f32 %v2245_v52, 0.0  ;;  %v2047_v62 = vadd.f32 %v2046_v28, %v2008_v50  ;;  %v1976_v45 = vadd.f32 %v4021_v42, %v4034_v54 }
 0x359   : > { %v2215_v1 = vadd.f32 %v2214_v16, %v2176_v63  ;;  %v2051_v53 = vpop.f32.mrf.mxu1  ;;  %v2015_v48 = vadd.f32 %v4249_v20, %v1976_v45 }
 0x35a   : > { %v2224_v29 = vpop.f32.mrf.mxu0 }
 0x35b   : > { %v2234_v32 = vadd.f32 %v2215_v1, %v2044_v4 }
 0x35d   : > { %v2246_v19 = vadd.f32 %v3851_v39, %v2234_v32 }
 0x35e   : > { %v2139_v3 = vpop.f32.mrf.mxu2 }
 0x35f   : > { %v2258_v47 = vmax.f32 %v2246_v19, 0.0  ;;  %v2179_v0 = vadd.f32 %v2178_v57, %v2139_v3 }
 0x361   : > { %v2266_v21 = vmax.f32 %v2257_v51, %v2258_v47  ;;  %v2218_v31 = vadd.f32 %v2217_v6, %v2179_v0  ;;  %v2053_v37 = vpop.f32.mrf.mxu1 }
 0x362   : > { %v2054_v18 = vadd.f32 %v2053_v37, %v2015_v48 }
 0x363   : > { %v2272_v46 = vmax.f32 %v3932_v9, %v2266_v21  ;;  %v2235_v24 = vadd.f32 %v2218_v31, %v2047_v62  ;;  %v1974_v9 = vadd.f32 %v4013_v5, %v4031_v35  ;;  %v2185_v35 = vpop.f32.mrf.mxu3 }
 0x365   : > { %2278 = vst [vmem:[%s4053_s22 + $0x18] sm:$0xff] %v2272_v46  ;;  %v2247_v23 = vadd.f32 %v3851_v39, %v2235_v24  ;;  %v2013_v61 = vadd.f32 %v4015_v58, %v1974_v9 }
 0x366   : > { %v2141_v34 = vpop.f32.mrf.mxu2 }
 0x367   : > { %v2181_v49 = vadd.f32 %v2180_v12, %v2141_v34  ;;  %v2259_v11 = vmax.f32 %v2247_v23, 0.0  ;;  %v2052_v5 = vadd.f32 %v2051_v53, %v2013_v61 }
 0x369   : > { %v2220_v44 = vadd.f32 %v2219_v10, %v2181_v49 }
 0x36b   : > { %v2236_v30 = vadd.f32 %v2220_v44, %v2049_v41 }
 0x36d   : > { %v2248_v36 = vadd.f32 %v3851_v39, %v2236_v30 }
 0x36e   : > { %v2144_v60 = vpop.f32.mrf.mxu2 }
 0x36f   : > { %v2260_v15 = vmax.f32 %v2248_v36, 0.0  ;;  %v2184_v14 = vadd.f32 %v2183_v8, %v2144_v60 }
 0x371   : > { %v2267_v38 = vmax.f32 %v2259_v11, %v2260_v15  ;;  %v2223_v43 = vadd.f32 %v2222_v26, %v2184_v14 }
 0x373   : > { %v2273_v16 = vmax.f32 %v3953_v40, %v2267_v38  ;;  %v2237_v25 = vadd.f32 %v2223_v43, %v2052_v5 }
 0x375   : > { %2279 = vst [vmem:[%s4053_s22 + $0x20] sm:$0xff] %v2273_v16  ;;  %v2249_v55 = vadd.f32 %v3851_v39, %v2237_v25 }
 0x376   : > { %v2146_v22 = vpop.f32.mrf.mxu2 }
 0x377   : > { %v2186_v2 = vadd.f32 %v2185_v35, %v2146_v22  ;;  %v2261_v40 = vmax.f32 %v2249_v55, 0.0 }
 0x379   : > { %v2225_v58 = vadd.f32 %v2224_v29, %v2186_v2 }
 0x37b   : > { %v2238_v42 = vadd.f32 %v2225_v58, %v2054_v18 }
 0x37d   : > { %v2250_v54 = vadd.f32 %v3851_v39, %v2238_v42 }
 0x37f   : > { %v2262_v33 = vmax.f32 %v2250_v54, 0.0 }
 0x381   : > { %v2268_v56 = vmax.f32 %v2261_v40, %v2262_v33 }
 0x383   : > { %v2274_v63 = vmax.f32 %v4250_v59, %v2268_v56 }
 0x385   : > { %2280 = vst [vmem:[%s4053_s22 + $0x28] sm:$0xff] %v2274_v63 }
 0x386 PF: > { %s15_s18 = sadd.s32 1, %s2919_s18  }
 0x387   : > { %p12_p4 = scmp.ge.s32.totalorder %s15_s18, 4  }
 0x389   :  { %14 = sbr.rel (!%p12_p4) target bundleno = 1 (0x1), region = 72 }

</bundles_post_ra>
